<compile_context>
chip_gen: v6e
topology: v6e:2x2x1
jax: 0.10.0
libtpu: 0.0.40
codegen_flags: <defaults>
</compile_context>

<pallas_src>
import jax
import jax.numpy as jnp
from jax.experimental import pallas as pl
from jax.experimental.pallas import tpu as pltpu


def _layernorm_affine(x, g, b, eps=1e-5):
    # PyTorch nn.LayerNorm semantics (biased variance, eps=1e-5) — reference only.
    mu = jnp.mean(x, axis=-1, keepdims=True)
    var = jnp.mean((x - mu) ** 2, axis=-1, keepdims=True)
    return (x - mu) * jax.lax.rsqrt(var + eps) * g + b


def node_encoder_kernel(x_ref, ce_ref,
                        w1, b1, w2, b2, w3, b3, w4, b4,
                        wf1, bf1, wf2, bf2, wf3, bf3,
                        out_ref):
    # x_ref:  (1, tn*S, d_node)   ce_ref: (1, 1, d_ext)   out_ref: (1, tn, hidden_pad)
    RS = x_ref.shape[1]
    TN = out_ref.shape[1]
    S = RS // TN

    def lin(h, w, b):
        # bf16 operands on the MXU, f32 accumulation, f32 bias add.
        return jnp.dot(h.astype(jnp.bfloat16), w[...],
                       preferred_element_type=jnp.float32) + b[...]

    def norm(h, eps=1e-5):
        # LayerNorm without affine (affine folded into the following Linear).
        mu = jnp.mean(h, axis=-1, keepdims=True)
        var = jnp.mean((h - mu) ** 2, axis=-1, keepdims=True)
        return (h - mu) * jax.lax.rsqrt(var + eps)

    x = x_ref[0]                                       # (TN*S, d_node), f32

    # shared_mlp: Linear -> ReLU -> LN (x3), then Linear to d_node_extanded
    h = norm(jnp.maximum(lin(x, w1, b1), 0.0))
    h = norm(jnp.maximum(lin(h, w2, b2), 0.0))
    h = norm(jnp.maximum(lin(h, w3, b3), 0.0))
    h = lin(h, w4, b4)                                 # (TN*S, d_ext)

    # torch.max(node, -2): max over the sub-ion axis
    h = jnp.max(h.reshape(TN, S, -1), axis=1)          # (TN, d_ext)

    # + per-batch charge embedding (broadcast over the tile's nodes)
    h = h + ce_ref[0]                                  # (1, d_ext) broadcasts

    # fc head: ReLU -> LN -> Linear -> ReLU -> LN -> Linear -> ReLU -> LN -> Linear
    h = norm(jnp.maximum(h, 0.0))
    h = norm(jnp.maximum(lin(h, wf1, bf1), 0.0))
    h = norm(jnp.maximum(lin(h, wf2, bf2), 0.0))
    out_ref[0] = lin(h, wf3, bf3)                      # (TN, hidden_pad), lane-dense


def init_params(key, d_ori_node, max_charge, max_subion_num, d_node,
                expansion_factor, hidden_size):
    d_ion_embed = d_node - d_ori_node
    d_ext = d_node * expansion_factor
    d_comp = (d_ext + hidden_size) // 2
    assert d_node % 8 == 0 and expansion_factor >= 8
    assert hidden_size <= d_comp <= d_ext and d_comp % 8 == 0

    kit = iter(jax.random.split(key, 32))

    def lin(fan_in, fan_out):
        w = (jax.random.normal(next(kit), (fan_in, fan_out), jnp.float32)
             / jnp.sqrt(jnp.float32(fan_in)))
        b = jax.random.normal(next(kit), (1, fan_out), jnp.float32) * 0.01
        return w, b

    def ln(d):
        return (jnp.ones((1, d), jnp.float32), jnp.zeros((1, d), jnp.float32))

    ion_tab = jax.random.normal(next(kit), (max_subion_num, d_ion_embed), jnp.float32)
    ion_tab = ion_tab.at[0].set(0.0)  # padding_idx=0
    charge_tab = jax.random.normal(next(kit), (max_charge, d_ext), jnp.float32)

    w1, b1 = lin(d_node, 2 * d_node); g1, be1 = ln(2 * d_node)
    w2, b2 = lin(2 * d_node, 4 * d_node); g2, be2 = ln(4 * d_node)
    w3, b3 = lin(4 * d_node, 8 * d_node); g3, be3 = ln(8 * d_node)
    w4, b4 = lin(8 * d_node, d_ext)
    gf0, bf0 = ln(d_ext)
    wf1, bf1 = lin(d_ext, d_comp); gf1, bef1 = ln(d_comp)
    wf2, bf2 = lin(d_comp, d_comp); gf2, bef2 = ln(d_comp)
    wf3, bf3 = lin(d_comp, hidden_size)

    weights = [w1, b1, g1, be1, w2, b2, g2, be2, w3, b3, g3, be3, w4, b4,
               gf0, bf0, wf1, bf1, gf1, bef1, wf2, bf2, gf2, bef2, wf3, bf3]
    return {"ion": ion_tab, "charge": charge_tab, "weights": weights,
            "hidden": hidden_size, "d_ext": d_ext}


def _fuse_weights(weights, hidden):
    """Fold each LayerNorm affine into the following Linear; bf16 matmul weights;
    pad the final Linear's output columns to a multiple of 128 lanes."""
    (w1, b1, g1, be1, w2, b2, g2, be2, w3, b3, g3, be3, w4, b4,
     gf0, bf0, wf1, bf1, gf1, bef1, wf2, bf2, gf2, bef2, wf3, bf3) = weights

    def fold(g, be, w, b):
        # (z*g + be) @ W + b  ==  z @ (g^T * W) + (be @ W + b)
        return w * g.reshape(-1, 1), b + be @ w

    w2f, b2f = fold(g1, be1, w2, b2)
    w3f, b3f = fold(g2, be2, w3, b3)
    w4f, b4f = fold(g3, be3, w4, b4)
    wf1f, bf1f = fold(gf0, bf0, wf1, bf1)
    wf2f, bf2f = fold(gf1, bef1, wf2, bf2)
    wf3f, bf3f = fold(gf2, bef2, wf3, bf3)

    hidden_pad = ((hidden + 127) // 128) * 128
    if hidden_pad != hidden:
        wf3f = jnp.pad(wf3f, ((0, 0), (0, hidden_pad - hidden)))
        bf3f = jnp.pad(bf3f, ((0, 0), (0, hidden_pad - hidden)))

    bf16 = lambda w: w.astype(jnp.bfloat16)
    fused = [bf16(w1), b1, bf16(w2f), b2f, bf16(w3f), b3f, bf16(w4f), b4f,
             bf16(wf1f), bf1f, bf16(wf2f), bf2f, bf16(wf3f), bf3f]
    return fused, hidden_pad


def node_encoder_forward(node_feat, node_sourceion, charge, params, *, tn=1024):
    B, N, S, _ = node_feat.shape
    hidden = params["hidden"]
    d_ext = params["d_ext"]

    # Glue: embedding gathers + concat (index gathers, not the hot path).
    src = params["ion"][node_sourceion]                      # (B, N, S, d_ion_embed)
    x = jnp.concatenate([node_feat, src], axis=-1)           # (B, N, S, d_node)
    d_node = x.shape[-1]
    ce = params["charge"][charge]                            # (B, d_ext) — NOT broadcast

    fused, hidden_pad = _fuse_weights(params["weights"], hidden)
    d_comp = fused[8].shape[1]

    # Row tile over nodes: as large as possible while keeping >= 2 grid steps total
    # (B >= 2 already gives that) and staying inside scoped VMEM.
    tn_eff = min(tn, N)
    if tn_eff < N:
        tn_eff = max(8, (tn_eff // 8) * 8)
    N_pad = ((N + tn_eff - 1) // tn_eff) * tn_eff
    if N_pad != N:
        x = jnp.pad(x, ((0, 0), (0, N_pad - N), (0, 0), (0, 0)))

    # Pre-flatten the sub-ion axis in the wrapper (free layout plumbing).
    x_flat = x.reshape(B, N_pad * S, d_node)
    ce3 = ce.reshape(B, 1, d_ext)

    grid = (B, N_pad // tn_eff)

    def const_spec(a):
        nd = a.ndim
        return pl.BlockSpec(a.shape, lambda b, n, _nd=nd: (0,) * _nd)

    in_specs = ([pl.BlockSpec((1, tn_eff * S, d_node), lambda b, n: (b, n, 0)),
                 pl.BlockSpec((1, 1, d_ext), lambda b, n: (b, 0, 0))]
                + [const_spec(w) for w in fused])
    out_specs = pl.BlockSpec((1, tn_eff, hidden_pad), lambda b, n: (b, n, 0))

    # Advisory cost estimate so XLA schedules the custom call sensibly.
    flops = (2 * B * N_pad * S * (d_node * 2 * d_node + 2 * d_node * 4 * d_node
                                  + 4 * d_node * 8 * d_node + 8 * d_node * d_ext)
             + 2 * B * N_pad * (d_ext * d_comp + d_comp * d_comp + d_comp * hidden_pad))
    transcendentals = B * N_pad * (3 * S + 3)  # one rsqrt per LayerNorm row
    bytes_accessed = (x_flat.size * 4 + B * N_pad * hidden_pad * 4 + ce.size * 4
                      + sum(int(w.size) * w.dtype.itemsize for w in fused))

    out = pl.pallas_call(
        node_encoder_kernel,
        out_shape=jax.ShapeDtypeStruct((B, N_pad, hidden_pad), jnp.float32),
        grid_spec=pltpu.PrefetchScalarGridSpec(
            num_scalar_prefetch=0,
            grid=grid,
            in_specs=in_specs,
            out_specs=out_specs,
        ),
        compiler_params=pltpu.CompilerParams(
            dimension_semantics=("parallel", "parallel"),
            vmem_limit_bytes=40 * 1024 * 1024,
        ),
        cost_estimate=pl.CostEstimate(flops=int(flops),
                                      transcendentals=int(transcendentals),
                                      bytes_accessed=int(bytes_accessed)),
    )(x_flat, ce3, *fused)

    return out[:, :N, :hidden]


def reference(node_feat, node_sourceion, charge, params):
    (w1, b1, g1, be1, w2, b2, g2, be2, w3, b3, g3, be3, w4, b4,
     gf0, bf0, wf1, bf1, gf1, bef1, wf2, bf2, gf2, bef2, wf3, bf3) = params["weights"]
    src = params["ion"][node_sourceion]
    x = jnp.concatenate([node_feat, src], axis=-1)

    def lin(h, w, b):
        return h @ w + b

    h = _layernorm_affine(jnp.maximum(lin(x, w1, b1), 0.0), g1, be1)
    h = _layernorm_affine(jnp.maximum(lin(h, w2, b2), 0.0), g2, be2)
    h = _layernorm_affine(jnp.maximum(lin(h, w3, b3), 0.0), g3, be3)
    h = lin(h, w4, b4)
    h = jnp.max(h, axis=-2)
    h = h + params["charge"][charge][:, None, :]
    h = _layernorm_affine(jnp.maximum(h, 0.0), gf0, bf0)
    h = _layernorm_affine(jnp.maximum(lin(h, wf1, bf1), 0.0), gf1, bef1)
    h = _layernorm_affine(jnp.maximum(lin(h, wf2, bf2), 0.0), gf2, bef2)
    return lin(h, wf3, bf3)


if __name__ == "__main__":
    # Small shapes consistent with the module's constraints.
    B, N, S = 2, 8, 4
    d_ori_node, max_charge, max_subion_num = 8, 4, 5
    d_node, expansion_factor, hidden_size = 16, 8, 32   # d_ext=128, d_comp=80

    key = jax.random.PRNGKey(0)
    kp, kf, ks, kc = jax.random.split(key, 4)
    params = init_params(kp, d_ori_node, max_charge, max_subion_num,
                         d_node, expansion_factor, hidden_size)

    node_feat = jax.random.normal(kf, (B, N, S, d_ori_node), jnp.float32)
    node_sourceion = jax.random.randint(ks, (B, N, S), 0, max_subion_num).astype(jnp.int32)
    charge = jax.random.randint(kc, (B,), 0, max_charge).astype(jnp.int32)

    out = node_encoder_forward(node_feat, node_sourceion, charge, params, tn=1024)
    out = jax.block_until_ready(out)

    ref = reference(node_feat, node_sourceion, charge, params)
    assert out.shape == (B, N, hidden_size)
    # Tolerance accounts for bf16 MXU operands (f32 accumulation, f32 LN/ReLU).
    assert jnp.allclose(out, ref, atol=5e-2, rtol=5e-2), "mismatch vs JAX reference"
    print("KERNEL_OK")
</pallas_src>

<mosaic_0001>
module attributes {stable_mosaic.version = 11 : i64} {
  func.func @node_encoder_kernel(%arg0: i32, %arg1: i32, %arg2: memref<1x32x16xf32, #tpu.memory_space<vmem>>, %arg3: memref<1x1x128xf32, #tpu.memory_space<vmem>>, %arg4: memref<16x32xbf16, #tpu.memory_space<vmem>>, %arg5: memref<1x32xf32, #tpu.memory_space<vmem>>, %arg6: memref<32x64xbf16, #tpu.memory_space<vmem>>, %arg7: memref<1x64xf32, #tpu.memory_space<vmem>>, %arg8: memref<64x128xbf16, #tpu.memory_space<vmem>>, %arg9: memref<1x128xf32, #tpu.memory_space<vmem>>, %arg10: memref<128x128xbf16, #tpu.memory_space<vmem>>, %arg11: memref<1x128xf32, #tpu.memory_space<vmem>>, %arg12: memref<128x80xbf16, #tpu.memory_space<vmem>>, %arg13: memref<1x80xf32, #tpu.memory_space<vmem>>, %arg14: memref<80x80xbf16, #tpu.memory_space<vmem>>, %arg15: memref<1x80xf32, #tpu.memory_space<vmem>>, %arg16: memref<80x128xbf16, #tpu.memory_space<vmem>>, %arg17: memref<1x128xf32, #tpu.memory_space<vmem>>, %arg18: memref<1x8x128xf32, #tpu.memory_space<vmem>>) attributes {dimension_semantics = [#tpu.dimension_semantics<parallel>, #tpu.dimension_semantics<parallel>], iteration_bounds = array<i64: 2, 1>, scalar_prefetch = 0 : i64, scratch_operands = 0 : i64, tpu.core_type = #tpu.core_type<tc>, window_params = [{transform_indices = @transform_0, window_bounds = array<i64: 1, 32, 16>}, {transform_indices = @transform_1, window_bounds = array<i64: 1, 1, 128>}, {pipeline_mode = #tpu.pipeline_mode<synchronous>, transform_indices = @transform_2, window_bounds = array<i64: 16, 32>}, {pipeline_mode = #tpu.pipeline_mode<synchronous>, transform_indices = @transform_3, window_bounds = array<i64: 1, 32>}, {pipeline_mode = #tpu.pipeline_mode<synchronous>, transform_indices = @transform_4, window_bounds = array<i64: 32, 64>}, {pipeline_mode = #tpu.pipeline_mode<synchronous>, transform_indices = @transform_5, window_bounds = array<i64: 1, 64>}, {pipeline_mode = #tpu.pipeline_mode<synchronous>, transform_indices = @transform_6, window_bounds = array<i64: 64, 128>}, {pipeline_mode = #tpu.pipeline_mode<synchronous>, transform_indices = @transform_7, window_bounds = array<i64: 1, 128>}, {pipeline_mode = #tpu.pipeline_mode<synchronous>, transform_indices = @transform_8, window_bounds = array<i64: 128, 128>}, {pipeline_mode = #tpu.pipeline_mode<synchronous>, transform_indices = @transform_9, window_bounds = array<i64: 1, 128>}, {pipeline_mode = #tpu.pipeline_mode<synchronous>, transform_indices = @transform_10, window_bounds = array<i64: 128, 80>}, {pipeline_mode = #tpu.pipeline_mode<synchronous>, transform_indices = @transform_11, window_bounds = array<i64: 1, 80>}, {pipeline_mode = #tpu.pipeline_mode<synchronous>, transform_indices = @transform_12, window_bounds = array<i64: 80, 80>}, {pipeline_mode = #tpu.pipeline_mode<synchronous>, transform_indices = @transform_13, window_bounds = array<i64: 1, 80>}, {pipeline_mode = #tpu.pipeline_mode<synchronous>, transform_indices = @transform_14, window_bounds = array<i64: 80, 128>}, {pipeline_mode = #tpu.pipeline_mode<synchronous>, transform_indices = @transform_15, window_bounds = array<i64: 1, 128>}, {transform_indices = @transform_16, window_bounds = array<i64: 1, 8, 128>}]} {
    %c0 = arith.constant 0 : index
    %c0_0 = arith.constant 0 : index
    %c0_1 = arith.constant 0 : index
    %0 = vector.load %arg2[%c0, %c0_0, %c0_1] : memref<1x32x16xf32, #tpu.memory_space<vmem>>, vector<1x32x16xf32>
    %1 = vector.shape_cast %0 : vector<1x32x16xf32> to vector<32x16xf32>
    %2 = arith.truncf %1 : vector<32x16xf32> to vector<32x16xbf16>
    %c0_2 = arith.constant 0 : index
    %c0_3 = arith.constant 0 : index
    %3 = vector.load %arg4[%c0_2, %c0_3] : memref<16x32xbf16, #tpu.memory_space<vmem>>, vector<16x32xbf16>
    %cst = arith.constant dense<0.000000e+00> : vector<32x32xf32>
    %4 = tpu.matmul %2, %3, %cst {dimension_numbers = #tpu.dot_dimension_numbers<[1], [0], [0], [1], [0, 0, 1, 1], [], []>} : vector<32x16xbf16>, vector<16x32xbf16>, vector<32x32xf32> -> vector<32x32xf32>
    %c0_4 = arith.constant 0 : index
    %c0_5 = arith.constant 0 : index
    %5 = vector.load %arg5[%c0_4, %c0_5] : memref<1x32xf32, #tpu.memory_space<vmem>>, vector<1x32xf32>
    %6 = vector.broadcast %5 : vector<1x32xf32> to vector<32x32xf32>
    %7 = arith.addf %4, %6 : vector<32x32xf32>
    %cst_6 = arith.constant 0.000000e+00 : f32
    %8 = vector.broadcast %cst_6 : f32 to vector<32x32xf32>
    %9 = arith.maximumf %7, %8 : vector<32x32xf32>
    %cst_7 = arith.constant dense<0.000000e+00> : vector<32xf32>
    %10 = vector.multi_reduction <add>, %9, %cst_7 [1] : vector<32x32xf32> to vector<32xf32>
    %11 = vector.shape_cast %10 : vector<32xf32> to vector<32x1xf32>
    %cst_8 = arith.constant 3.200000e+01 : f32
    %12 = vector.broadcast %cst_8 : f32 to vector<32x1xf32>
    %13 = arith.divf %11, %12 : vector<32x1xf32>
    %14 = vector.broadcast %13 : vector<32x1xf32> to vector<32x32xf32>
    %15 = arith.subf %9, %14 : vector<32x32xf32>
    %16 = arith.mulf %15, %15 : vector<32x32xf32>
    %cst_9 = arith.constant dense<0.000000e+00> : vector<32xf32>
    %17 = vector.multi_reduction <add>, %16, %cst_9 [1] : vector<32x32xf32> to vector<32xf32>
    %18 = vector.shape_cast %17 : vector<32xf32> to vector<32x1xf32>
    %cst_10 = arith.constant 3.200000e+01 : f32
    %19 = vector.broadcast %cst_10 : f32 to vector<32x1xf32>
    %20 = arith.divf %18, %19 : vector<32x1xf32>
    %21 = vector.broadcast %13 : vector<32x1xf32> to vector<32x32xf32>
    %22 = arith.subf %9, %21 : vector<32x32xf32>
    %cst_11 = arith.constant 9.99999974E-6 : f32
    %23 = vector.broadcast %cst_11 : f32 to vector<32x1xf32>
    %24 = arith.addf %20, %23 : vector<32x1xf32>
    %25 = math.rsqrt %24 : vector<32x1xf32>
    %26 = vector.broadcast %25 : vector<32x1xf32> to vector<32x32xf32>
    %27 = arith.mulf %22, %26 : vector<32x32xf32>
    %28 = arith.truncf %27 : vector<32x32xf32> to vector<32x32xbf16>
    %c0_12 = arith.constant 0 : index
    %c0_13 = arith.constant 0 : index
    %29 = vector.load %arg6[%c0_12, %c0_13] : memref<32x64xbf16, #tpu.memory_space<vmem>>, vector<32x64xbf16>
    %cst_14 = arith.constant dense<0.000000e+00> : vector<32x64xf32>
    %30 = tpu.matmul %28, %29, %cst_14 {dimension_numbers = #tpu.dot_dimension_numbers<[1], [0], [0], [1], [0, 0, 1, 1], [], []>} : vector<32x32xbf16>, vector<32x64xbf16>, vector<32x64xf32> -> vector<32x64xf32>
    %c0_15 = arith.constant 0 : index
    %c0_16 = arith.constant 0 : index
    %31 = vector.load %arg7[%c0_15, %c0_16] : memref<1x64xf32, #tpu.memory_space<vmem>>, vector<1x64xf32>
    %32 = vector.broadcast %31 : vector<1x64xf32> to vector<32x64xf32>
    %33 = arith.addf %30, %32 : vector<32x64xf32>
    %cst_17 = arith.constant 0.000000e+00 : f32
    %34 = vector.broadcast %cst_17 : f32 to vector<32x64xf32>
    %35 = arith.maximumf %33, %34 : vector<32x64xf32>
    %cst_18 = arith.constant dense<0.000000e+00> : vector<32xf32>
    %36 = vector.multi_reduction <add>, %35, %cst_18 [1] : vector<32x64xf32> to vector<32xf32>
    %37 = vector.shape_cast %36 : vector<32xf32> to vector<32x1xf32>
    %cst_19 = arith.constant 6.400000e+01 : f32
    %38 = vector.broadcast %cst_19 : f32 to vector<32x1xf32>
    %39 = arith.divf %37, %38 : vector<32x1xf32>
    %40 = vector.broadcast %39 : vector<32x1xf32> to vector<32x64xf32>
    %41 = arith.subf %35, %40 : vector<32x64xf32>
    %42 = arith.mulf %41, %41 : vector<32x64xf32>
    %cst_20 = arith.constant dense<0.000000e+00> : vector<32xf32>
    %43 = vector.multi_reduction <add>, %42, %cst_20 [1] : vector<32x64xf32> to vector<32xf32>
    %44 = vector.shape_cast %43 : vector<32xf32> to vector<32x1xf32>
    %cst_21 = arith.constant 6.400000e+01 : f32
    %45 = vector.broadcast %cst_21 : f32 to vector<32x1xf32>
    %46 = arith.divf %44, %45 : vector<32x1xf32>
    %47 = vector.broadcast %39 : vector<32x1xf32> to vector<32x64xf32>
    %48 = arith.subf %35, %47 : vector<32x64xf32>
    %cst_22 = arith.constant 9.99999974E-6 : f32
    %49 = vector.broadcast %cst_22 : f32 to vector<32x1xf32>
    %50 = arith.addf %46, %49 : vector<32x1xf32>
    %51 = math.rsqrt %50 : vector<32x1xf32>
    %52 = vector.broadcast %51 : vector<32x1xf32> to vector<32x64xf32>
    %53 = arith.mulf %48, %52 : vector<32x64xf32>
    %54 = arith.truncf %53 : vector<32x64xf32> to vector<32x64xbf16>
    %c0_23 = arith.constant 0 : index
    %c0_24 = arith.constant 0 : index
    %55 = vector.load %arg8[%c0_23, %c0_24] : memref<64x128xbf16, #tpu.memory_space<vmem>>, vector<64x128xbf16>
    %cst_25 = arith.constant dense<0.000000e+00> : vector<32x128xf32>
    %56 = tpu.matmul %54, %55, %cst_25 {dimension_numbers = #tpu.dot_dimension_numbers<[1], [0], [0], [1], [0, 0, 1, 1], [], []>} : vector<32x64xbf16>, vector<64x128xbf16>, vector<32x128xf32> -> vector<32x128xf32>
    %c0_26 = arith.constant 0 : index
    %c0_27 = arith.constant 0 : index
    %57 = vector.load %arg9[%c0_26, %c0_27] : memref<1x128xf32, #tpu.memory_space<vmem>>, vector<1x128xf32>
    %58 = vector.broadcast %57 : vector<1x128xf32> to vector<32x128xf32>
    %59 = arith.addf %56, %58 : vector<32x128xf32>
    %cst_28 = arith.constant 0.000000e+00 : f32
    %60 = vector.broadcast %cst_28 : f32 to vector<32x128xf32>
    %61 = arith.maximumf %59, %60 : vector<32x128xf32>
    %cst_29 = arith.constant dense<0.000000e+00> : vector<32xf32>
    %62 = vector.multi_reduction <add>, %61, %cst_29 [1] : vector<32x128xf32> to vector<32xf32>
    %63 = vector.shape_cast %62 : vector<32xf32> to vector<32x1xf32>
    %cst_30 = arith.constant 1.280000e+02 : f32
    %64 = vector.broadcast %cst_30 : f32 to vector<32x1xf32>
    %65 = arith.divf %63, %64 : vector<32x1xf32>
    %66 = vector.broadcast %65 : vector<32x1xf32> to vector<32x128xf32>
    %67 = arith.subf %61, %66 : vector<32x128xf32>
    %68 = arith.mulf %67, %67 : vector<32x128xf32>
    %cst_31 = arith.constant dense<0.000000e+00> : vector<32xf32>
    %69 = vector.multi_reduction <add>, %68, %cst_31 [1] : vector<32x128xf32> to vector<32xf32>
    %70 = vector.shape_cast %69 : vector<32xf32> to vector<32x1xf32>
    %cst_32 = arith.constant 1.280000e+02 : f32
    %71 = vector.broadcast %cst_32 : f32 to vector<32x1xf32>
    %72 = arith.divf %70, %71 : vector<32x1xf32>
    %73 = vector.broadcast %65 : vector<32x1xf32> to vector<32x128xf32>
    %74 = arith.subf %61, %73 : vector<32x128xf32>
    %cst_33 = arith.constant 9.99999974E-6 : f32
    %75 = vector.broadcast %cst_33 : f32 to vector<32x1xf32>
    %76 = arith.addf %72, %75 : vector<32x1xf32>
    %77 = math.rsqrt %76 : vector<32x1xf32>
    %78 = vector.broadcast %77 : vector<32x1xf32> to vector<32x128xf32>
    %79 = arith.mulf %74, %78 : vector<32x128xf32>
    %80 = arith.truncf %79 : vector<32x128xf32> to vector<32x128xbf16>
    %c0_34 = arith.constant 0 : index
    %c0_35 = arith.constant 0 : index
    %81 = vector.load %arg10[%c0_34, %c0_35] : memref<128x128xbf16, #tpu.memory_space<vmem>>, vector<128x128xbf16>
    %cst_36 = arith.constant dense<0.000000e+00> : vector<32x128xf32>
    %82 = tpu.matmul %80, %81, %cst_36 {dimension_numbers = #tpu.dot_dimension_numbers<[1], [0], [0], [1], [0, 0, 1, 1], [], []>} : vector<32x128xbf16>, vector<128x128xbf16>, vector<32x128xf32> -> vector<32x128xf32>
    %c0_37 = arith.constant 0 : index
    %c0_38 = arith.constant 0 : index
    %83 = vector.load %arg11[%c0_37, %c0_38] : memref<1x128xf32, #tpu.memory_space<vmem>>, vector<1x128xf32>
    %84 = vector.broadcast %83 : vector<1x128xf32> to vector<32x128xf32>
    %85 = arith.addf %82, %84 : vector<32x128xf32>
    %86 = vector.shape_cast %85 : vector<32x128xf32> to vector<8x4x128xf32>
    %cst_39 = arith.constant dense<0xFF800000> : vector<8x128xf32>
    %87 = vector.multi_reduction <maximumf>, %86, %cst_39 [1] : vector<8x4x128xf32> to vector<8x128xf32>
    %c0_40 = arith.constant 0 : index
    %c0_41 = arith.constant 0 : index
    %c0_42 = arith.constant 0 : index
    %88 = vector.load %arg3[%c0_40, %c0_41, %c0_42] : memref<1x1x128xf32, #tpu.memory_space<vmem>>, vector<1x1x128xf32>
    %89 = vector.shape_cast %88 : vector<1x1x128xf32> to vector<1x128xf32>
    %90 = vector.broadcast %89 : vector<1x128xf32> to vector<8x128xf32>
    %91 = arith.addf %87, %90 : vector<8x128xf32>
    %cst_43 = arith.constant 0.000000e+00 : f32
    %92 = vector.broadcast %cst_43 : f32 to vector<8x128xf32>
    %93 = arith.maximumf %91, %92 : vector<8x128xf32>
    %cst_44 = arith.constant dense<0.000000e+00> : vector<8xf32>
    %94 = vector.multi_reduction <add>, %93, %cst_44 [1] : vector<8x128xf32> to vector<8xf32>
    %95 = vector.shape_cast %94 : vector<8xf32> to vector<8x1xf32>
    %cst_45 = arith.constant 1.280000e+02 : f32
    %96 = vector.broadcast %cst_45 : f32 to vector<8x1xf32>
    %97 = arith.divf %95, %96 : vector<8x1xf32>
    %98 = vector.broadcast %97 : vector<8x1xf32> to vector<8x128xf32>
    %99 = arith.subf %93, %98 : vector<8x128xf32>
    %100 = arith.mulf %99, %99 : vector<8x128xf32>
    %cst_46 = arith.constant dense<0.000000e+00> : vector<8xf32>
    %101 = vector.multi_reduction <add>, %100, %cst_46 [1] : vector<8x128xf32> to vector<8xf32>
    %102 = vector.shape_cast %101 : vector<8xf32> to vector<8x1xf32>
    %cst_47 = arith.constant 1.280000e+02 : f32
    %103 = vector.broadcast %cst_47 : f32 to vector<8x1xf32>
    %104 = arith.divf %102, %103 : vector<8x1xf32>
    %105 = vector.broadcast %97 : vector<8x1xf32> to vector<8x128xf32>
    %106 = arith.subf %93, %105 : vector<8x128xf32>
    %cst_48 = arith.constant 9.99999974E-6 : f32
    %107 = vector.broadcast %cst_48 : f32 to vector<8x1xf32>
    %108 = arith.addf %104, %107 : vector<8x1xf32>
    %109 = math.rsqrt %108 : vector<8x1xf32>
    %110 = vector.broadcast %109 : vector<8x1xf32> to vector<8x128xf32>
    %111 = arith.mulf %106, %110 : vector<8x128xf32>
    %112 = arith.truncf %111 : vector<8x128xf32> to vector<8x128xbf16>
    %c0_49 = arith.constant 0 : index
    %c0_50 = arith.constant 0 : index
    %113 = vector.load %arg12[%c0_49, %c0_50] : memref<128x80xbf16, #tpu.memory_space<vmem>>, vector<128x80xbf16>
    %cst_51 = arith.constant dense<0.000000e+00> : vector<8x80xf32>
    %114 = tpu.matmul %112, %113, %cst_51 {dimension_numbers = #tpu.dot_dimension_numbers<[1], [0], [0], [1], [0, 0, 1, 1], [], []>} : vector<8x128xbf16>, vector<128x80xbf16>, vector<8x80xf32> -> vector<8x80xf32>
    %c0_52 = arith.constant 0 : index
    %c0_53 = arith.constant 0 : index
    %115 = vector.load %arg13[%c0_52, %c0_53] : memref<1x80xf32, #tpu.memory_space<vmem>>, vector<1x80xf32>
    %116 = vector.broadcast %115 : vector<1x80xf32> to vector<8x80xf32>
    %117 = arith.addf %114, %116 : vector<8x80xf32>
    %cst_54 = arith.constant 0.000000e+00 : f32
    %118 = vector.broadcast %cst_54 : f32 to vector<8x80xf32>
    %119 = arith.maximumf %117, %118 : vector<8x80xf32>
    %cst_55 = arith.constant dense<0.000000e+00> : vector<8xf32>
    %120 = vector.multi_reduction <add>, %119, %cst_55 [1] : vector<8x80xf32> to vector<8xf32>
    %121 = vector.shape_cast %120 : vector<8xf32> to vector<8x1xf32>
    %cst_56 = arith.constant 8.000000e+01 : f32
    %122 = vector.broadcast %cst_56 : f32 to vector<8x1xf32>
    %123 = arith.divf %121, %122 : vector<8x1xf32>
    %124 = vector.broadcast %123 : vector<8x1xf32> to vector<8x80xf32>
    %125 = arith.subf %119, %124 : vector<8x80xf32>
    %126 = arith.mulf %125, %125 : vector<8x80xf32>
    %cst_57 = arith.constant dense<0.000000e+00> : vector<8xf32>
    %127 = vector.multi_reduction <add>, %126, %cst_57 [1] : vector<8x80xf32> to vector<8xf32>
    %128 = vector.shape_cast %127 : vector<8xf32> to vector<8x1xf32>
    %cst_58 = arith.constant 8.000000e+01 : f32
    %129 = vector.broadcast %cst_58 : f32 to vector<8x1xf32>
    %130 = arith.divf %128, %129 : vector<8x1xf32>
    %131 = vector.broadcast %123 : vector<8x1xf32> to vector<8x80xf32>
    %132 = arith.subf %119, %131 : vector<8x80xf32>
    %cst_59 = arith.constant 9.99999974E-6 : f32
    %133 = vector.broadcast %cst_59 : f32 to vector<8x1xf32>
    %134 = arith.addf %130, %133 : vector<8x1xf32>
    %135 = math.rsqrt %134 : vector<8x1xf32>
    %136 = vector.broadcast %135 : vector<8x1xf32> to vector<8x80xf32>
    %137 = arith.mulf %132, %136 : vector<8x80xf32>
    %138 = arith.truncf %137 : vector<8x80xf32> to vector<8x80xbf16>
    %c0_60 = arith.constant 0 : index
    %c0_61 = arith.constant 0 : index
    %139 = vector.load %arg14[%c0_60, %c0_61] : memref<80x80xbf16, #tpu.memory_space<vmem>>, vector<80x80xbf16>
    %cst_62 = arith.constant dense<0.000000e+00> : vector<8x80xf32>
    %140 = tpu.matmul %138, %139, %cst_62 {dimension_numbers = #tpu.dot_dimension_numbers<[1], [0], [0], [1], [0, 0, 1, 1], [], []>} : vector<8x80xbf16>, vector<80x80xbf16>, vector<8x80xf32> -> vector<8x80xf32>
    %c0_63 = arith.constant 0 : index
    %c0_64 = arith.constant 0 : index
    %141 = vector.load %arg15[%c0_63, %c0_64] : memref<1x80xf32, #tpu.memory_space<vmem>>, vector<1x80xf32>
    %142 = vector.broadcast %141 : vector<1x80xf32> to vector<8x80xf32>
    %143 = arith.addf %140, %142 : vector<8x80xf32>
    %cst_65 = arith.constant 0.000000e+00 : f32
    %144 = vector.broadcast %cst_65 : f32 to vector<8x80xf32>
    %145 = arith.maximumf %143, %144 : vector<8x80xf32>
    %cst_66 = arith.constant dense<0.000000e+00> : vector<8xf32>
    %146 = vector.multi_reduction <add>, %145, %cst_66 [1] : vector<8x80xf32> to vector<8xf32>
    %147 = vector.shape_cast %146 : vector<8xf32> to vector<8x1xf32>
    %cst_67 = arith.constant 8.000000e+01 : f32
    %148 = vector.broadcast %cst_67 : f32 to vector<8x1xf32>
    %149 = arith.divf %147, %148 : vector<8x1xf32>
    %150 = vector.broadcast %149 : vector<8x1xf32> to vector<8x80xf32>
    %151 = arith.subf %145, %150 : vector<8x80xf32>
    %152 = arith.mulf %151, %151 : vector<8x80xf32>
    %cst_68 = arith.constant dense<0.000000e+00> : vector<8xf32>
    %153 = vector.multi_reduction <add>, %152, %cst_68 [1] : vector<8x80xf32> to vector<8xf32>
    %154 = vector.shape_cast %153 : vector<8xf32> to vector<8x1xf32>
    %cst_69 = arith.constant 8.000000e+01 : f32
    %155 = vector.broadcast %cst_69 : f32 to vector<8x1xf32>
    %156 = arith.divf %154, %155 : vector<8x1xf32>
    %157 = vector.broadcast %149 : vector<8x1xf32> to vector<8x80xf32>
    %158 = arith.subf %145, %157 : vector<8x80xf32>
    %cst_70 = arith.constant 9.99999974E-6 : f32
    %159 = vector.broadcast %cst_70 : f32 to vector<8x1xf32>
    %160 = arith.addf %156, %159 : vector<8x1xf32>
    %161 = math.rsqrt %160 : vector<8x1xf32>
    %162 = vector.broadcast %161 : vector<8x1xf32> to vector<8x80xf32>
    %163 = arith.mulf %158, %162 : vector<8x80xf32>
    %164 = arith.truncf %163 : vector<8x80xf32> to vector<8x80xbf16>
    %c0_71 = arith.constant 0 : index
    %c0_72 = arith.constant 0 : index
    %165 = vector.load %arg16[%c0_71, %c0_72] : memref<80x128xbf16, #tpu.memory_space<vmem>>, vector<80x128xbf16>
    %cst_73 = arith.constant dense<0.000000e+00> : vector<8x128xf32>
    %166 = tpu.matmul %164, %165, %cst_73 {dimension_numbers = #tpu.dot_dimension_numbers<[1], [0], [0], [1], [0, 0, 1, 1], [], []>} : vector<8x80xbf16>, vector<80x128xbf16>, vector<8x128xf32> -> vector<8x128xf32>
    %c0_74 = arith.constant 0 : index
    %c0_75 = arith.constant 0 : index
    %167 = vector.load %arg17[%c0_74, %c0_75] : memref<1x128xf32, #tpu.memory_space<vmem>>, vector<1x128xf32>
    %168 = vector.broadcast %167 : vector<1x128xf32> to vector<8x128xf32>
    %169 = arith.addf %166, %168 : vector<8x128xf32>
    %c0_76 = arith.constant 0 : index
    %c0_77 = arith.constant 0 : index
    %c0_78 = arith.constant 0 : index
    %170 = vector.load %arg18[%c0_76, %c0_77, %c0_78] : memref<1x8x128xf32, #tpu.memory_space<vmem>>, vector<1x8x128xf32>
    %171 = vector.shape_cast %170 : vector<1x8x128xf32> to vector<8x128xf32>
    %172 = vector.shape_cast %169 : vector<8x128xf32> to vector<1x8x128xf32>
    tpu.vector_store %arg18[%c0_76, %c0_77, %c0_78], %172 {strides = array<i32>} : memref<1x8x128xf32, #tpu.memory_space<vmem>>, vector<1x8x128xf32>,
    return
  }
  func.func @transform_0(%arg0: i32, %arg1: i32) -> (i32, i32, i32) {
    %c0_i32 = arith.constant 0 : i32
    %c0_i32_0 = arith.constant 0 : i32
    return %arg0, %arg1, %c0_i32 : i32, i32, i32
  }
  func.func @transform_1(%arg0: i32, %arg1: i32) -> (i32, i32, i32) {
    %c0_i32 = arith.constant 0 : i32
    %c0_i32_0 = arith.constant 0 : i32
    %c0_i32_1 = arith.constant 0 : i32
    return %arg0, %c0_i32, %c0_i32_0 : i32, i32, i32
  }
  func.func @transform_2(%arg0: i32, %arg1: i32) -> (i32, i32) {
    %c0_i32 = arith.constant 0 : i32
    %c0_i32_0 = arith.constant 0 : i32
    %c0_i32_1 = arith.constant 0 : i32
    return %c0_i32, %c0_i32_0 : i32, i32
  }
  func.func @transform_3(%arg0: i32, %arg1: i32) -> (i32, i32) {
    %c0_i32 = arith.constant 0 : i32
    %c0_i32_0 = arith.constant 0 : i32
    %c0_i32_1 = arith.constant 0 : i32
    return %c0_i32, %c0_i32_0 : i32, i32
  }
  func.func @transform_4(%arg0: i32, %arg1: i32) -> (i32, i32) {
    %c0_i32 = arith.constant 0 : i32
    %c0_i32_0 = arith.constant 0 : i32
    %c0_i32_1 = arith.constant 0 : i32
    return %c0_i32, %c0_i32_0 : i32, i32
  }
  func.func @transform_5(%arg0: i32, %arg1: i32) -> (i32, i32) {
    %c0_i32 = arith.constant 0 : i32
    %c0_i32_0 = arith.constant 0 : i32
    %c0_i32_1 = arith.constant 0 : i32
    return %c0_i32, %c0_i32_0 : i32, i32
  }
  func.func @transform_6(%arg0: i32, %arg1: i32) -> (i32, i32) {
    %c0_i32 = arith.constant 0 : i32
    %c0_i32_0 = arith.constant 0 : i32
    %c0_i32_1 = arith.constant 0 : i32
    return %c0_i32, %c0_i32_0 : i32, i32
  }
  func.func @transform_7(%arg0: i32, %arg1: i32) -> (i32, i32) {
    %c0_i32 = arith.constant 0 : i32
    %c0_i32_0 = arith.constant 0 : i32
    %c0_i32_1 = arith.constant 0 : i32
    return %c0_i32, %c0_i32_0 : i32, i32
  }
  func.func @transform_8(%arg0: i32, %arg1: i32) -> (i32, i32) {
    %c0_i32 = arith.constant 0 : i32
    %c0_i32_0 = arith.constant 0 : i32
    %c0_i32_1 = arith.constant 0 : i32
    return %c0_i32, %c0_i32_0 : i32, i32
  }
  func.func @transform_9(%arg0: i32, %arg1: i32) -> (i32, i32) {
    %c0_i32 = arith.constant 0 : i32
    %c0_i32_0 = arith.constant 0 : i32
    %c0_i32_1 = arith.constant 0 : i32
    return %c0_i32, %c0_i32_0 : i32, i32
  }
  func.func @transform_10(%arg0: i32, %arg1: i32) -> (i32, i32) {
    %c0_i32 = arith.constant 0 : i32
    %c0_i32_0 = arith.constant 0 : i32
    %c0_i32_1 = arith.constant 0 : i32
    return %c0_i32, %c0_i32_0 : i32, i32
  }
  func.func @transform_11(%arg0: i32, %arg1: i32) -> (i32, i32) {
    %c0_i32 = arith.constant 0 : i32
    %c0_i32_0 = arith.constant 0 : i32
    %c0_i32_1 = arith.constant 0 : i32
    return %c0_i32, %c0_i32_0 : i32, i32
  }
  func.func @transform_12(%arg0: i32, %arg1: i32) -> (i32, i32) {
    %c0_i32 = arith.constant 0 : i32
    %c0_i32_0 = arith.constant 0 : i32
    %c0_i32_1 = arith.constant 0 : i32
    return %c0_i32, %c0_i32_0 : i32, i32
  }
  func.func @transform_13(%arg0: i32, %arg1: i32) -> (i32, i32) {
    %c0_i32 = arith.constant 0 : i32
    %c0_i32_0 = arith.constant 0 : i32
    %c0_i32_1 = arith.constant 0 : i32
    return %c0_i32, %c0_i32_0 : i32, i32
  }
  func.func @transform_14(%arg0: i32, %arg1: i32) -> (i32, i32) {
    %c0_i32 = arith.constant 0 : i32
    %c0_i32_0 = arith.constant 0 : i32
    %c0_i32_1 = arith.constant 0 : i32
    return %c0_i32, %c0_i32_0 : i32, i32
  }
  func.func @transform_15(%arg0: i32, %arg1: i32) -> (i32, i32) {
    %c0_i32 = arith.constant 0 : i32
    %c0_i32_0 = arith.constant 0 : i32
    %c0_i32_1 = arith.constant 0 : i32
    return %c0_i32, %c0_i32_0 : i32, i32
  }
  func.func @transform_16(%arg0: i32, %arg1: i32) -> (i32, i32, i32) {
    %c0_i32 = arith.constant 0 : i32
    %c0_i32_0 = arith.constant 0 : i32
    return %arg0, %arg1, %c0_i32 : i32, i32, i32
  }
}

</mosaic_0001>

<bundles_post_ra>
// kernel: tpu_custom_call.1
= control target key start
LH: loop header
LB: loop body
LE: loop exit
PB: predicated region body
PF: predicated region fallthrough
CT: control target
= control target key end

     0   :  { %s2887_s0 = inlined_call_operand.vmem [shape: f32[2,32,16], index: 0, kind: input, shape index: {}]   ;;  %s2888_s1 = inlined_call_operand.hbm [shape: f32[2,1,128], index: 1, kind: input, shape index: {}]   ;;  %s2889_s2 = inlined_call_operand.hbm [shape: bf16[16,32], index: 2, kind: input, shape index: {}]   ;;  %s2890_s3 = inlined_call_operand.vmem [shape: f32[1,32], index: 3, kind: input, shape index: {}]   ;;  %s2891_s4 = inlined_call_operand.vmem [shape: bf16[32,64], index: 4, kind: input, shape index: {}]   ;;  %s2892_s5 = inlined_call_operand.vmem [shape: f32[1,64], index: 5, kind: input, shape index: {}]   ;;  %s2893_s6 = inlined_call_operand.hbm [shape: bf16[64,128], index: 6, kind: input, shape index: {}]   ;;  %s2894_s7 = inlined_call_operand.vmem [shape: f32[1,128], index: 7, kind: input, shape index: {}]   ;;  %s2895_s8 = inlined_call_operand.vmem [shape: bf16[128,128], index: 8, kind: input, shape index: {}]   ;;  %s2896_s9 = inlined_call_operand.vmem [shape: f32[1,128], index: 9, kind: input, shape index: {}]   ;;  %s2897_s10 = inlined_call_operand.vmem [shape: bf16[128,80], index: 10, kind: input, shape index: {}]   ;;  %s2898_s11 = inlined_call_operand.vmem [shape: f32[1,80], index: 11, kind: input, shape index: {}]   ;;  %s2899_s12 = inlined_call_operand.vmem [shape: bf16[80,80], index: 12, kind: input, shape index: {}]   ;;  %s2900_s13 = inlined_call_operand.vmem [shape: f32[1,80], index: 13, kind: input, shape index: {}]   ;;  %s2901_s14 = inlined_call_operand.vmem [shape: bf16[80,128], index: 14, kind: input, shape index: {}]   ;;  %s2902_s15 = inlined_call_operand.vmem [shape: f32[1,128], index: 15, kind: input, shape index: {}]   ;;  %s2903_s16 = inlined_call_operand.hbm [shape: f32[2,8,128], index: 16, kind: output, shape index: {}]  }
   0x1   :  { %2914 = sst [smem:[#allocation16_spill]] %s2887_s0 }
   0x2   :  { %2915 = sst [smem:[#allocation17_spill]] %s2889_s2 }
   0x3   :  { %2916 = sst [smem:[#allocation18_spill]] %s2893_s6 }
   0x4   :  { %2917 = sst [smem:[#allocation19_spill]] %s2900_s13 }
   0x5   :  { %2918 = sst [smem:[#allocation20_spill]] %s2901_s14 }
   0x6   :  { %2919 = sst [smem:[#allocation21_spill]] %s2902_s15 }
   0x7   :  { %2920 = sst [smem:[#allocation22_spill]] %s2903_s16 }
   0x8   :  { %21 = vsyncpa [#allocation3], 0 }
   0x9   :  { %23 = vsyncpa [#allocation3 + $0x1], 0 }
   0xa   :  { %24 = vsyncpa [#allocation6], 0 }
   0xb   :  { %25 = vsyncpa [#allocation4], 0 }
   0xc   :  { %27 = vsyncpa [#allocation4 + $0x1], 0  ;;  %s2469_s21 = smov 0   ;;  %s2471_s22 = smov 0  }
   0xd   :  { %s2473_s23 = smov 0   ;;  %s2475_s24 = smov 0  }
   0xe   :  { %s2477_s25 = smov 0   ;;  %s2479_s26 = smov 0  }
   0xf LB: > { %2921 = sst [smem:[#allocation12_spill]] %s2354_s21  ;;  %s1855_s27 = sadd.s32 4294967295, %s2374_s26   ;;  %s2374_s26 = sphi %s2479_s26, %s33_s26   ;;  %s2370_s25 = sphi %s2477_s25, %s2953_s25   ;;  %s2366_s24 = sphi %s2475_s24, %s2952_s24   ;;  %s2362_s23 = sphi %s2473_s23, %s2951_s23   ;;  %s2358_s22 = sphi %s2471_s22, %s2950_s22   ;;  %s2354_s21 = sphi %s2469_s21, %s2949_s21  }
  0x10   : > { %s1856_s28 = sadd.s32 4294967294, %s2374_s26   ;;  %p93_p0 = scmp.ne.s32.totalorder %s2358_s22, %s2354_s21 }
  0x11   : > { %p2503_p1 = scmp.eq.s32.totalorder %s1855_s27, 0  ;;  %p2507_p2 = scmp.eq.s32.totalorder %s1855_s27, 1 }
  0x12   : > { %p419_p3 = scmp.eq.s32.totalorder %s1856_s28, 1  ;;  %p1857_p5 = scmp.ge.s32.totalorder %s2374_s26, 1 }
  0x13   : > { %s2922_s29 = scalar_select %p2503_p1, 1, 0 }
  0x14   : > { %p2513_p4 = por %p2503_p1, %p93_p0  ;;  %p2518_p6 = por %p419_p3, %p93_p0 }
  0x15   : > { %p426_p7 = scmp.lt.s32.totalorder %s2374_s26, 3  ;;  %s2376_s19 = smov [#allocation5]  }
  0x16   : > { %s2924_s0 = scalar_select %p2513_p4, 1, 0 }
  0x17   : > { %s2925_s17 = scalar_select %p2518_p6, 1, 0 }
  0x18   : > { %p2523_p8 = pnand %p1857_p5, %p426_p7  ;;  %s438_s20 = sshll.u32 %s2376_s19, 4  ;;  %s439_s20 = int_to_ptr.vmem [resolvable:$true] %s438_s20 }
  0x19   : > { %2926 = sst [smem:[#allocation13_spill]] %s2925_s17  ;;  %s2377_s28 = smov [#allocation7]  }
  0x1a   : > { %p2072_p9 = pneg %p2523_p8  ;;  %s460_s17 = sshll.u32 %s2377_s28, 4  ;;  %s461_s17 = int_to_ptr.vmem [resolvable:$true] %s460_s17 }
  0x1b   : > { %s2221_s21 = scalar_lea.vmem %s439_s20, 128  ;;  %p2229_p5 = scmp.lt.s32.totalorder %s439_s20, %s439_s20 }
  0x1c   : > { %p2532_p11 = pnand %p2072_p9, %p2503_p1  ;;  %p2222_p13 = scmp.ne.s32.totalorder %s439_s20, %s2221_s21 }
  0x1d   : > { %p2230_p7 = scmp.lt.s32.totalorder %s2221_s21, %s2221_s21 }
  0x1e   : > { %p2212_p12 = pneg %p2532_p11 }
  0x1f   : > { %p2231_p10 = por %p2230_p7, %p2229_p5 }
  0x20   : > { %p2224_p0 = pnand %p2222_p13, %p2212_p12 }
  0x22   : > { %p2225_p3 = pneg %p2224_p0 }
  0x24   : > { %p2232_p9 = pnand %p2231_p10, %p2225_p3 }
  0x26   : > { %2235 = shalt.err (!%p2232_p9)
}
  0x27   : > { %s2378_s19 = smov 64   ;;  %s2379_s16 = smov 4  }
  0x28   : > { %s2929_s2 = sld [smem:[#allocation17_spill]]  ;;  %s2247_s14 = scalar_lea.vmem %s461_s17, 512 }
  0x29   : > { %p2248_p6 = scmp.ne.s32.totalorder %s461_s17, %s2247_s14  ;;  %p2255_p1 = scmp.lt.s32.totalorder %s461_s17, %s461_s17 }
  0x2a   : > { %p2256_p4 = scmp.lt.s32.totalorder %s2247_s14, %s2247_s14 }
  0x2b   : > { %p2250_p13 = pnand %p2248_p6, %p2212_p12 }
  0x2c   : > { %p2257_p5 = por %p2256_p4, %p2255_p1 }
  0x2d   : > { %p2251_p0 = pneg %p2250_p13 }
  0x2e   : > { %2075 = dma.hbm_to_vmem [thread:$0]  (!%p2532_p11), %s2929_s2, 128, %s439_s20, [#allocation6], %s2378_s19, %s2378_s19, %s2379_s16  }
  0x2f   : > { %p2258_p10 = pnand %p2257_p5, %p2251_p0 }
  0x31   : > { %2261 = shalt.err (!%p2258_p10)
}
  0x32   : > { %s2930_s6 = sld [smem:[#allocation18_spill]]  ;;  %s45_s14 = sadd.s32 1, %s2370_s25 }
  0x33   : > { %s80_s15 = sadd.s32 1, %s2362_s23  ;;  %p47_p1 = scmp.ge.s32.totalorder %s45_s14, 2 }
  0x34   : > { %p87_p4 = scmp.ne.s32.totalorder %s2362_s23, %s2358_s22  ;;  %p88_p6 = scmp.eq.s32.totalorder %s2374_s26, 0 }
  0x35   : > { %p2089_p12 = scmp.lt.s32.totalorder %s2374_s26, 2  ;;  %s2955_s14 = smov (%p47_p1, %s45_s14), 0 }
  0x36   : > { %2931 = sst [smem:[#allocation14_spill]] %s2955_s14  ;;  %p89_p3 = por %p88_p6, %p87_p4 }
  0x37   : > { %p2564_p7 = por %p2507_p2, %p87_p4  ;;  %s77_s20 = ssub.s32 %s2370_s25, %s2955_s14 }
  0x38   : > { %2078 = dma.hbm_to_vmem [thread:$0]  (!%p2532_p11), %s2930_s6, 512, %s461_s17, [#allocation6], %s2378_s19, %s2378_s19, %s2379_s16  }
  0x39   : > { %s2932_s13 = scalar_select %p2564_p7, 1, 0 }
  0x3a   : > { %s514_s27 = sand.u32 1, %s2362_s23   ;;  %p78_p9 = scmp.eq.s32.totalorder %s77_s20, 0 }
  0x3b   : > { %2933 = sst [smem:[#allocation15_spill]] %s2932_s13  ;;  %s1861_s16 = sshll.u32 %s2370_s25, 4 }
  0x3c   : > { %s2573_s17 = scalar_select %p78_p9, %s2362_s23, %s80_s15  }
  0x3d   : > { %s522_s21 = scalar_lea.hbm %s2888_s1, %s1861_s16  ;;  %s517_s2 = scalar_lea.vmem [#allocation2], %s514_s27 }
  0x3e   : > { %s524_s6 = sshll.u32 %s517_s2, 4  ;;  %p2580_p11 = pnand %p2089_p12, %p89_p3  ;;  %s525_s6 = int_to_ptr.vmem [resolvable:$true] %s524_s6 }
  0x3f   : > { %s515_s13 = scalar_lea.sflag [#allocation3], %s514_s27  ;;  %s2275_s20 = scalar_lea.vmem %s525_s6, 16 }
  0x40   : > { %p2264_p2 = pneg %p2580_p11  ;;  %p2276_p13 = scmp.ne.s32.totalorder %s525_s6, %s2275_s20 }
  0x41   : > { %s2380_s15 = smov [#allocation2]  }
  0x42   : > { %p2278_p0 = pnand %p2276_p13, %p2264_p2  ;;  %s2280_s14 = sshll.u32 %s2380_s15, 4  ;;  %s2281_s14 = int_to_ptr.vmem [resolvable:$false] %s2280_s14 }
  0x43   : > { %s2282_s16 = scalar_lea.vmem %s2281_s14, 32  ;;  %p2283_p10 = scmp.lt.s32.totalorder %s525_s6, %s2281_s14 }
  0x44   : > { %p2279_p5 = pneg %p2278_p0  ;;  %p2284_p1 = scmp.lt.s32.totalorder %s2282_s16, %s2275_s20 }
  0x46   : > { %p2285_p4 = por %p2284_p1, %p2283_p10 }
  0x48   : > { %p2286_p6 = pnand %p2285_p4, %p2279_p5 }
  0x4a   : > { %2289 = shalt.err (!%p2286_p6)
}
  0x4b   : > { %2082 = dma.hbm_to_vmem [thread:$0]  (!%p2580_p11), %s522_s21, 16, %s525_s6, %s515_s13  }
  0x4c   : > { %533 = sbr.rel (%p2523_p8) target bundleno = 3405 (0xd4d), region = 84  ;;  %s2591_s2 = sand.u32 (!%p2523_p8), 1, %s2358_s22  }
  0x4d   : > { %s536_s27 = scalar_lea.sflag (!%p2523_p8), [#allocation3], %s2591_s2  ;;  %s538_s19 = scalar_lea.vmem (!%p2523_p8), [#allocation2], %s2591_s2 }
  0x4e   : > { %p2935_p12 = scmp.ne.s32.totalorder (!%p2523_p8), %s2924_s0, 0 }
  0x51   : > { %2341 = dma.done.wait (%p2935_p12), %s536_s27, 16  }
  0x52   : > { %2343 = vsyncadd (%p2935_p12), %s536_s27, 4294967280  ;;  %p2936_p3 = scmp.ne.s32.totalorder %s2922_s29, 0 }
  0x54   : > { %2345 = dma.done.wait (%p2936_p3), [#allocation6], 640  }
  0x55   : > { %2347 = vsyncadd (%p2936_p3), [#allocation6], 4294966656  ;;  %p604_p8 = scmp.lt.s32.totalorder %s2366_s24, 1  ;;  %s2937_s28 = sld [smem:[#allocation16_spill]]  ;;  %v2147_v0 = vld [vmem:[#allocation5] sm:$0xff]   ;;  %vm635_vm0 = vcmask 130048  }
  0x56   : > { %1966 = vmatprep.subr.bf16.mxu1 %v2147_v0  ;;  %v1868_v7 = vld [vmem:[%s2890_s3] ss:$0 sm:$0xff]  ;;  %vm695_vm1 = vcmask 261120   ;;  %v2148_v44 = vld [vmem:[%s2891_s4 + $0x8] sm:$0xff]   ;;  %vm833_vm2 = vcmask 523264   ;;  %vm1166_vm3 = vcmask 1043456  }
  0x57   : > { %s605_s6 = scalar_select %p604_p8, %s2366_s24, 1  ;;  %1967 = vmatpush3.bf16.msra.mxu1 %v2147_v0  ;;  %v2149_v45 = vld [vmem:[%s2891_s4] sm:$0xff]   ;;  %vm1255_vm4 = vcmask 1041409   ;;  %vm1258_vm5 = vcmask 1042434   ;;  %vm1261_vm6 = vcmask 1043459   ;;  %vm1264_vm7 = vcmask 1044484  }
  0x58   : > { %1972 = vmatprep.subr.bf16.mxu1 %v2148_v44  ;;  %vm1267_vm8 = vcmask 1045509   ;;  %vm1270_vm9 = vcmask 1046534   ;;  %vm1273_vm10 = vcmask 1047559   ;;  %vm2382_vm11 = vmmov 0   ;;  %s2938_s20 = sld [smem:[#allocation19_spill]]  ;;  %s1865_s30 = sshll.u32 %s2591_s2, 3 }
  0x59   : > { %s1921_s18 = sshll.u32 %s605_s6, 5  ;;  %vm1515_vm12 = vcmask 654336   ;;  %s2939_s27 = sld [smem:[#allocation20_spill]] }
  0x5a   : > { %s2941_s16 = sld [smem:[#allocation21_spill]]  ;;  %s1918_s6 = sshll.u32 %s2366_s24, 7 }
  0x5b   : > { %s611_s21 = scalar_lea.vmem %s2937_s28, %s1921_s18  ;;  %s602_s18 = scalar_lea.vmem [#allocation8], %s1865_s30 }
  0x5c   : > { %v614_v1 = vld [vmem:[%s611_s21] sm:$0xff]  ;;  %v615_v2 = vld [vmem:[%s611_s21 + $0x8] sm:$0xff]  ;;  %v616_v3 = vld [vmem:[%s611_s21 + $0x10] sm:$0xff]  ;;  %s1742_s14 = sshll.u32 %s602_s18, 4  ;;  %s2383_s24 = smov [#allocation8]   ;;  %s2841_s14 = int_to_ptr.vmem [resolvable:$true] %s1742_s14 }
  0x5d   : > { %v618_v4 = vpack.c.bf16 %v615_v2, %v614_v1  ;;  %v617_v5 = vld [vmem:[%s611_s21 + $0x18] sm:$0xff]  ;;  %s2942_s21 = sld [smem:[#allocation22_spill]]  ;;  %s2290_s15 = scalar_lea.vmem %s2841_s14, 128 }
  0x5e   : > { %v619_v6 = vpack.c.bf16 %v617_v5, %v616_v3  ;;  %v1872_v5 = vld [vmem:[%s2892_s5] ss:$0 sm:$0xff]  ;;  %p2291_p9 = scmp.ne.s32.totalorder %s2841_s14, %s2290_s15  ;;  %s2294_s30 = sshll.u32 %s2383_s24, 4  ;;  %s2295_s30 = int_to_ptr.vmem [resolvable:$false] %s2294_s30 }
  0x5f   : > { %1968 = vmatprep.mubr.msk.bf16.mxu1 %vm635_vm0, %v618_v4  ;;  %p2297_p13 = scmp.lt.s32.totalorder %s2841_s14, %s2295_s30 }
  0x60   : > { %1969 = vmatmul.mubr.msk.bf16.vlgmr.msra.gmra.mxu1 %vm635_vm0, %v619_v6  ;;  %p2292_p11 = pnand %p2291_p9, %p2564_p7 }
  0x61   : > { %1973 = vmatpush3.bf16.msra.mxu1 %v2148_v44  ;;  %v2153_v44 = vld [vmem:[#allocation7] sm:$0xff]  }
  0x62   : > { %1974 = vmatprep.subr.bf16.mxu1 %v2149_v45  ;;  %p2293_p2 = pneg %p2292_p11 }
  0x63   : > { %s2943_s29 = smov %s2942_s21  ;;  %s2839_s0 = scalar_lea.hbm %s2942_s21, %s1918_s6 }
  0x65   : > { %1975 = vmatpush3.bf16.msra.mxu1 %v2149_v45 }
 0x120   : > { %v1970_v8 = vpop.f32.mrf.mxu1 }
 0x121   : > { %v685_v9 = vadd.f32 %v1970_v8, %v1868_v7 }
 0x122   : > { %v676_v10 = vpop.f32.mrf.mxu1 }
 0x123   : > { %v693_v11 = vmax.f32 %v685_v9, 0.0  ;;  %v677_v12 = vadd.f32 %v1868_v7, %v676_v10 }
 0x124   : > { %v1971_v13 = vpop.f32.mrf.mxu1 }
 0x125   : > { %v691_v14 = vmax.f32 %v677_v12, 0.0  ;;  %v688_v15 = vadd.f32 %v1971_v13, %v1868_v7  ;;  %v702_v16 = vsel %vm695_vm1, %v693_v11, 0.0 }
 0x126   : > { %703 = vadd.xlane.f32.xlu1 %v702_v16  ;;  %v679_v17 = vpop.f32.mrf.mxu1 }
 0x127   : > { %v694_v18 = vmax.f32 %v688_v15, 0.0  ;;  %v680_v19 = vadd.f32 %v1868_v7, %v679_v17  ;;  %v696_v20 = vsel %vm695_vm1, %v691_v14, 0.0 }
 0x128   : > { %697 = vadd.xlane.f32.xlu0 %v696_v20 }
 0x129   : > { %v692_v21 = vmax.f32 %v680_v19, 0.0  ;;  %v705_v22 = vsel %vm695_vm1, %v694_v18, 0.0 }
 0x12a   : > { %706 = vadd.xlane.f32.xlu1 %v705_v22 }
 0x12b   : > { %v699_v23 = vsel %vm695_vm1, %v692_v21, 0.0 }
 0x12c   : > { %700 = vadd.xlane.f32.xlu0 %v699_v23 }
 0x1af   : > { %v704_v24 = vpop.xlane.xlu1 %703 }
 0x1b0   : > { %v711_v25 = vmul.f32 0.03125, %v704_v24 }
 0x1b1   : > { %v698_v26 = vpop.xlane.xlu0 %697 }
 0x1b2   : > { %v709_v27 = vmul.f32 0.03125, %v698_v26  ;;  %v715_v29 = vsub.f32 %v693_v11, %v711_v25 }
 0x1b3   : > { %v707_v28 = vpop.xlane.xlu1 %706 }
 0x1b4   : > { %v713_v30 = vsub.f32 %v691_v14, %v709_v27  ;;  %v712_v31 = vmul.f32 0.03125, %v707_v28  ;;  %v719_v38 = vmul.f32 %v715_v29, %v715_v29 }
 0x1b5   : > { %v701_v32 = vpop.xlane.xlu0 %700 }
 0x1b6   : > { %v710_v33 = vmul.f32 0.03125, %v701_v32  ;;  %v717_v34 = vmul.f32 %v713_v30, %v713_v30  ;;  %v716_v35 = vsub.f32 %v694_v18, %v712_v31  ;;  %v727_v40 = vsel %vm695_vm1, %v719_v38, 0.0 }
 0x1b8   : > { %v714_v36 = vsub.f32 %v692_v21, %v710_v33  ;;  %v721_v37 = vsel %vm695_vm1, %v717_v34, 0.0  ;;  %v720_v42 = vmul.f32 %v716_v35, %v716_v35 }
 0x1b9   : > { %722 = vadd.xlane.f32.xlu0 %v721_v37 }
 0x1ba   : > { %v718_v39 = vmul.f32 %v714_v36, %v714_v36  ;;  %v730_v43 = vsel %vm695_vm1, %v720_v42, 0.0  ;;  %v2151_v42 = vld [vmem:[#allocation7 + $0x10] sm:$0xff]  }
 0x1bc   : > { %v724_v41 = vsel %vm695_vm1, %v718_v39, 0.0 }
 0x1bd   : > { %728 = vadd.xlane.f32.xlu0 %v727_v40  ;;  %725 = vadd.xlane.f32.xlu1 %v724_v41  ;;  %v2150_v41 = vld [vmem:[#allocation7 + $0x18] sm:$0xff]  }
 0x1be   : > { %1980 = vmatprep.subr.bf16.mxu0 %v2150_v41 }
 0x1bf   : > { %1981 = vmatpush3.bf16.msra.mxu0 %v2150_v41 }
 0x1c0   : > { %1982 = vmatprep.subr.bf16.mxu0 %v2151_v42 }
 0x1c1   : > { %731 = vadd.xlane.f32.xlu1 %v730_v43  ;;  %v2152_v43 = vld [vmem:[#allocation7 + $0x8] sm:$0xff]  }
 0x1c3   : > { %1983 = vmatpush3.bf16.msra.mxu0 %v2151_v42 }
 0x1c4   : > { %1984 = vmatprep.subr.bf16.mxu0 %v2152_v43 }
 0x1c7   : > { %1985 = vmatpush3.bf16.msra.mxu0 %v2152_v43 }
 0x1c8   : > { %1986 = vmatprep.subr.bf16.mxu0 %v2153_v44 }
 0x1cb   : > { %1987 = vmatpush3.bf16.msra.mxu0 %v2153_v44 }
 0x242   : > { %v723_v46 = vpop.xlane.xlu0 %722 }
 0x243   : > { %v733_v47 = vmul.f32 0.03125, %v723_v46 }
 0x245   : > { %v737_v48 = vadd.f32 1e-05, %v733_v47 }
 0x246   : > { %v726_v49 = vpop.xlane.xlu1 %725  ;;  %v729_v50 = vpop.xlane.xlu0 %728 }
 0x247   : > { %v734_v51 = vmul.f32 0.03125, %v726_v49  ;;  %v735_v52 = vmul.f32 0.03125, %v729_v50  ;;  %2180 = vrsqrt.f32 %v737_v48 }
 0x249   : > { %v738_v53 = vadd.f32 1e-05, %v734_v51  ;;  %v739_v54 = vadd.f32 1e-05, %v735_v52 }
 0x24a   : > { %v732_v55 = vpop.xlane.xlu1 %731 }
 0x24b   : > { %2182 = vrsqrt.f32 %v738_v53  ;;  %v736_v56 = vmul.f32 0.03125, %v732_v55 }
 0x24c   : > { %2184 = vrsqrt.f32 %v739_v54 }
 0x24d   : > { %v740_v57 = vadd.f32 1e-05, %v736_v56 }
 0x24f   : > { %2186 = vrsqrt.f32 %v740_v57 }
 0x254   : > { %v2181_v58 = vpop.eup %2180 }
 0x255   : > { %v745_v60 = vmul.f32 %v2181_v58, %v713_v30 }
 0x258   : > { %v2183_v59 = vpop.eup %2182 }
 0x259   : > { %v746_v61 = vmul.f32 %v2183_v59, %v714_v36  ;;  %v2185_v62 = vpop.eup %2184 }
 0x25a   : > { %v747_v1 = vmul.f32 %v2185_v62, %v715_v29 }
 0x25b   : > { %v749_v63 = vpack.c.bf16 %v746_v61, %v745_v60 }
 0x25c   : > { %v2187_v0 = vpop.eup %2186 }
 0x25d   : > { %1976 = vmatprep.mubr.msk.bf16.mxu1 %vm695_vm1, %v749_v63  ;;  %v748_v2 = vmul.f32 %v2187_v0, %v716_v35 }
 0x25f   : > { %v750_v3 = vpack.c.bf16 %v748_v2, %v747_v1 }
 0x261   : > { %1977 = vmatmul.mubr.msk.bf16.vlgmr.msra.gmra.mxu1 %vm695_vm1, %v750_v3 }
 0x321   : > { %v1978_v4 = vpop.f32.mrf.mxu1 }
 0x322   : > { %v823_v7 = vadd.f32 %v1978_v4, %v1872_v5  ;;  %v1877_v4 = vld [vmem:[%s2894_s7] ss:$0 sm:$0xff] }
 0x323   : > { %v814_v6 = vpop.f32.mrf.mxu1 }
 0x324   : > { %v815_v8 = vadd.f32 %v1872_v5, %v814_v6  ;;  %v831_v12 = vmax.f32 %v823_v7, 0.0 }
 0x325   : > { %v1979_v9 = vpop.f32.mrf.mxu1 }
 0x326   : > { %v829_v10 = vmax.f32 %v815_v8, 0.0  ;;  %v826_v13 = vadd.f32 %v1979_v9, %v1872_v5  ;;  %v840_v19 = vsel %vm833_vm2, %v831_v12, 0.0 }
 0x327   : > { %v817_v11 = vpop.f32.mrf.mxu1 }
 0x328   : > { %v818_v14 = vadd.f32 %v1872_v5, %v817_v11  ;;  %v834_v15 = vsel %vm833_vm2, %v829_v10, 0.0  ;;  %v832_v17 = vmax.f32 %v826_v13, 0.0 }
 0x329   : > { %835 = vadd.xlane.f32.xlu0 %v834_v15 }
 0x32a   : > { %v830_v16 = vmax.f32 %v818_v14, 0.0  ;;  %v843_v20 = vsel %vm833_vm2, %v832_v17, 0.0 }
 0x32c   : > { %v837_v18 = vsel %vm833_vm2, %v830_v16, 0.0 }
 0x32d   : > { %838 = vadd.xlane.f32.xlu1 %v837_v18  ;;  %841 = vadd.xlane.f32.xlu0 %v840_v19 }
 0x331   : > { %844 = vadd.xlane.f32.xlu1 %v843_v20 }
 0x3b2   : > { %v836_v21 = vpop.xlane.xlu0 %835 }
 0x3b3   : > { %v847_v22 = vmul.f32 0.015625, %v836_v21 }
 0x3b5   : > { %v851_v23 = vsub.f32 %v829_v10, %v847_v22 }
 0x3b6   : > { %v839_v24 = vpop.xlane.xlu1 %838  ;;  %v842_v25 = vpop.xlane.xlu0 %841 }
 0x3b7   : > { %v848_v26 = vmul.f32 0.015625, %v839_v24  ;;  %v849_v27 = vmul.f32 0.015625, %v842_v25  ;;  %v855_v28 = vmul.f32 %v851_v23, %v851_v23 }
 0x3b9   : > { %v852_v29 = vsub.f32 %v830_v16, %v848_v26  ;;  %v853_v30 = vsub.f32 %v831_v12, %v849_v27  ;;  %v859_v31 = vsel %vm833_vm2, %v855_v28, 0.0  ;;  %v2154_v16 = vld [vmem:[%s2895_s8 + $0x38] sm:$0xff]  }
 0x3ba   : > { %v845_v32 = vpop.xlane.xlu1 %844  ;;  %860 = vadd.xlane.f32.xlu0 %v859_v31  ;;  %1992 = vmatprep.subr.bf16.mxu1 %v2154_v16 }
 0x3bb   : > { %v850_v33 = vmul.f32 0.015625, %v845_v32  ;;  %v856_v34 = vmul.f32 %v852_v29, %v852_v29  ;;  %v857_v35 = vmul.f32 %v853_v30, %v853_v30  ;;  %1993 = vmatpush3.bf16.msra.mxu1 %v2154_v16 }
 0x3bd   : > { %v854_v36 = vsub.f32 %v832_v17, %v850_v33  ;;  %v862_v37 = vsel %vm833_vm2, %v856_v34, 0.0  ;;  %v865_v38 = vsel %vm833_vm2, %v857_v35, 0.0  ;;  %v2155_v33 = vld [vmem:[%s2895_s8 + $0x30] sm:$0xff]   ;;  %v2156_v34 = vld [vmem:[%s2895_s8 + $0x28] sm:$0xff]   ;;  %v2157_v35 = vld [vmem:[%s2895_s8 + $0x20] sm:$0xff]  }
 0x3be   : > { %863 = vadd.xlane.f32.xlu1 %v862_v37  ;;  %866 = vadd.xlane.f32.xlu0 %v865_v38  ;;  %v2159_v37 = vld [vmem:[%s2895_s8 + $0x10] sm:$0xff]   ;;  %v2160_v38 = vld [vmem:[%s2895_s8 + $0x8] sm:$0xff]  }
 0x3bf   : > { %v858_v39 = vmul.f32 %v854_v36, %v854_v36  ;;  %1994 = vmatprep.subr.bf16.mxu1 %v2155_v33 }
 0x3c0   : > { %1995 = vmatpush3.bf16.msra.mxu1 %v2155_v33 }
 0x3c1   : > { %v868_v40 = vsel %vm833_vm2, %v858_v39, 0.0  ;;  %1996 = vmatprep.subr.bf16.mxu1 %v2156_v34  ;;  %v2161_v39 = vld [vmem:[%s2895_s8] sm:$0xff]  }
 0x3c2   : > { %869 = vadd.xlane.f32.xlu1 %v868_v40 }
 0x3c4   : > { %1997 = vmatpush3.bf16.msra.mxu1 %v2156_v34 }
 0x3c5   : > { %1998 = vmatprep.subr.bf16.mxu1 %v2157_v35 }
 0x3c8   : > { %1999 = vmatpush3.bf16.msra.mxu1 %v2157_v35 }
 0x443   : > { %v861_v45 = vpop.xlane.xlu0 %860 }
 0x444   : > { %v871_v46 = vmul.f32 0.015625, %v861_v45 }
 0x446   : > { %v875_v47 = vadd.f32 1e-05, %v871_v46 }
 0x447   : > { %v864_v48 = vpop.xlane.xlu1 %863  ;;  %v867_v49 = vpop.xlane.xlu0 %866 }
 0x448   : > { %v872_v50 = vmul.f32 0.015625, %v864_v48  ;;  %v873_v51 = vmul.f32 0.015625, %v867_v49  ;;  %2188 = vrsqrt.f32 %v875_v47 }
 0x44a   : > { %v876_v52 = vadd.f32 1e-05, %v872_v50  ;;  %v877_v53 = vadd.f32 1e-05, %v873_v51 }
 0x44b   : > { %v870_v54 = vpop.xlane.xlu1 %869 }
 0x44c   : > { %2190 = vrsqrt.f32 %v876_v52  ;;  %v874_v55 = vmul.f32 0.015625, %v870_v54 }
 0x44d   : > { %2192 = vrsqrt.f32 %v877_v53 }
 0x44e   : > { %v878_v56 = vadd.f32 1e-05, %v874_v55 }
 0x450   : > { %2194 = vrsqrt.f32 %v878_v56 }
 0x455   : > { %v2189_v57 = vpop.eup %2188 }
 0x456   : > { %v883_v59 = vmul.f32 %v2189_v57, %v851_v23 }
 0x459   : > { %v2191_v58 = vpop.eup %2190 }
 0x45a   : > { %v884_v60 = vmul.f32 %v2191_v58, %v852_v29  ;;  %v2193_v61 = vpop.eup %2192 }
 0x45b   : > { %v885_v0 = vmul.f32 %v2193_v61, %v853_v30 }
 0x45c   : > { %v887_v62 = vpack.c.bf16 %v884_v60, %v883_v59 }
 0x45d   : > { %v2195_v63 = vpop.eup %2194 }
 0x45e   : > { %1988 = vmatprep.mubr.msk.bf16.mxu0 %vm833_vm2, %v887_v62  ;;  %v886_v1 = vmul.f32 %v2195_v63, %v854_v36  ;;  %v2158_v36 = vld [vmem:[%s2895_s8 + $0x18] sm:$0xff]   ;;  %v1884_v62 = vld [vmem:[%s2896_s9] ss:$0 sm:$0xff] }
 0x45f   : > { %2000 = vmatprep.subr.bf16.mxu1 %v2158_v36 }
 0x460   : > { %v888_v2 = vpack.c.bf16 %v886_v1, %v885_v0  ;;  %2001 = vmatpush3.bf16.msra.mxu1 %v2158_v36 }
 0x461   : > { %2002 = vmatprep.subr.bf16.mxu1 %v2159_v37 }
 0x462   : > { %1989 = vmatmul.mubr.msk.bf16.vlgmr.msra.gmra.mxu0 %vm833_vm2, %v888_v2 }
 0x464   : > { %2003 = vmatpush3.bf16.msra.mxu1 %v2159_v37 }
 0x465   : > { %2004 = vmatprep.subr.bf16.mxu1 %v2160_v38 }
 0x468   : > { %2005 = vmatpush3.bf16.msra.mxu1 %v2160_v38 }
 0x469   : > { %2006 = vmatprep.subr.bf16.mxu1 %v2161_v39 }
 0x46c   : > { %2007 = vmatpush3.bf16.msra.mxu1 %v2161_v39 }
 0x522   : > { %v1990_v3 = vpop.f32.mrf.mxu0 }
 0x523   : > { %v977_v8 = vadd.f32 %v1990_v3, %v1877_v4 }
 0x524   : > { %v968_v5 = vpop.f32.mrf.mxu0 }
 0x525   : > { %v969_v6 = vadd.f32 %v1877_v4, %v968_v5  ;;  %v985_v12 = vmax.f32 %v977_v8, 0.0 }
 0x526   : > { %v1991_v7 = vpop.f32.mrf.mxu0 }
 0x527   : > { %v983_v9 = vmax.f32 %v969_v6, 0.0  ;;  %v980_v13 = vadd.f32 %v1991_v7, %v1877_v4 }
 0x528   : > { %v971_v10 = vpop.f32.mrf.mxu0 }
 0x529   : > { %v972_v11 = vadd.f32 %v1877_v4, %v971_v10  ;;  %987 = vadd.xlane.f32.xlu0 %v983_v9  ;;  %v986_v15 = vmax.f32 %v980_v13, 0.0 }
 0x52b   : > { %v984_v14 = vmax.f32 %v972_v11, 0.0 }
 0x52d   : > { %989 = vadd.xlane.f32.xlu1 %v984_v14  ;;  %991 = vadd.xlane.f32.xlu0 %v985_v12 }
 0x531   : > { %993 = vadd.xlane.f32.xlu1 %v986_v15 }
 0x5b2   : > { %v988_v17 = vpop.xlane.xlu0 %987 }
 0x5b3   : > { %v996_v18 = vmul.f32 0.0078125, %v988_v17 }
 0x5b5   : > { %v1000_v19 = vsub.f32 %v983_v9, %v996_v18 }
 0x5b6   : > { %v990_v20 = vpop.xlane.xlu1 %989  ;;  %v992_v21 = vpop.xlane.xlu0 %991 }
 0x5b7   : > { %v997_v22 = vmul.f32 0.0078125, %v990_v20  ;;  %v998_v23 = vmul.f32 0.0078125, %v992_v21  ;;  %v1004_v24 = vmul.f32 %v1000_v19, %v1000_v19 }
 0x5b9   : > { %v1001_v25 = vsub.f32 %v984_v14, %v997_v22  ;;  %v1002_v26 = vsub.f32 %v985_v12, %v998_v23  ;;  %1008 = vadd.xlane.f32.xlu0 %v1004_v24 }
 0x5ba   : > { %v994_v27 = vpop.xlane.xlu1 %993 }
 0x5bb   : > { %v999_v28 = vmul.f32 0.0078125, %v994_v27  ;;  %v1005_v29 = vmul.f32 %v1001_v25, %v1001_v25  ;;  %v1006_v30 = vmul.f32 %v1002_v26, %v1002_v26 }
 0x5bd   : > { %v1003_v31 = vsub.f32 %v986_v15, %v999_v28  ;;  %1010 = vadd.xlane.f32.xlu1 %v1005_v29  ;;  %1012 = vadd.xlane.f32.xlu0 %v1006_v30 }
 0x5bf   : > { %v1007_v32 = vmul.f32 %v1003_v31, %v1003_v31 }
 0x5c1   : > { %1014 = vadd.xlane.f32.xlu1 %v1007_v32 }
 0x642   : > { %v1009_v40 = vpop.xlane.xlu0 %1008 }
 0x643   : > { %v1016_v41 = vmul.f32 0.0078125, %v1009_v40 }
 0x645   : > { %v1020_v42 = vadd.f32 1e-05, %v1016_v41 }
 0x646   : > { %v1011_v43 = vpop.xlane.xlu1 %1010  ;;  %v1013_v44 = vpop.xlane.xlu0 %1012 }
 0x647   : > { %v1017_v45 = vmul.f32 0.0078125, %v1011_v43  ;;  %v1018_v46 = vmul.f32 0.0078125, %v1013_v44  ;;  %2196 = vrsqrt.f32 %v1020_v42 }
 0x649   : > { %v1021_v47 = vadd.f32 1e-05, %v1017_v45  ;;  %v1022_v48 = vadd.f32 1e-05, %v1018_v46 }
 0x64a   : > { %v1015_v49 = vpop.xlane.xlu1 %1014 }
 0x64b   : > { %2198 = vrsqrt.f32 %v1021_v47  ;;  %v1019_v50 = vmul.f32 0.0078125, %v1015_v49 }
 0x64c   : > { %2200 = vrsqrt.f32 %v1022_v48 }
 0x64d   : > { %v1023_v51 = vadd.f32 1e-05, %v1019_v50 }
 0x64f   : > { %2202 = vrsqrt.f32 %v1023_v51 }
 0x654   : > { %v2197_v52 = vpop.eup %2196 }
 0x655   : > { %v1028_v54 = vmul.f32 %v2197_v52, %v1000_v19 }
 0x658   : > { %v2199_v53 = vpop.eup %2198 }
 0x659   : > { %v1029_v55 = vmul.f32 %v2199_v53, %v1001_v25  ;;  %v2201_v56 = vpop.eup %2200 }
 0x65a   : > { %v1030_v59 = vmul.f32 %v2201_v56, %v1002_v26 }
 0x65b   : > { %v1032_v57 = vpack.c.bf16 %v1029_v55, %v1028_v54 }
 0x65c   : > { %v2203_v58 = vpop.eup %2202 }
 0x65d   : > { %2008 = vmatprep.mubr.bf16.mxu1 %v1032_v57  ;;  %v1031_v60 = vmul.f32 %v2203_v58, %v1003_v31 }
 0x65f   : > { %v1033_v61 = vpack.c.bf16 %v1031_v60, %v1030_v59  ;;  %v1893_v59 = vld [vmem:[%s538_s19] ss:$0 sm:$0xff] }
 0x661   : > { %2009 = vmatmul.mubr.bf16.vlgmr.msra.gmra.mxu1 %v1033_v61 }
 0x721   : > { %v2010_v63 = vpop.f32.mrf.mxu1 }
 0x722   : > { %v1148_v0 = vadd.f32 %v2010_v63, %v1884_v62 }
 0x723   : > { %v1139_v1 = vpop.f32.mrf.mxu1 }
 0x724   : > { %v1160_v2 = vcombine.high %v1148_v0, %v1148_v0  ;;  %v1195_v3 = vsel %vm1166_vm3, %v1148_v0, -inf  ;;  %v1140_v4 = vadd.f32 %v1884_v62, %v1139_v1 }
 0x725   : > { %v1196_v5 = vrot.slane %v1195_v3, 4  ;;  %v2011_v6 = vpop.f32.mrf.mxu1 }
 0x726   : > { %v1202_v7 = vsel %vm1166_vm3, %v1160_v2, -inf  ;;  %v1158_v8 = vcombine.high %v1140_v4, %v1140_v4  ;;  %v1167_v9 = vsel %vm1166_vm3, %v1140_v4, -inf  ;;  %v1151_v10 = vadd.f32 %v2011_v6, %v1884_v62 }
 0x727   : > { %v1197_v11 = vmax.f32 %v1195_v3, %v1196_v5  ;;  %v1203_v12 = vrot.slane %v1202_v7, 4  ;;  %v1168_v13 = vrot.slane %v1167_v9, 4  ;;  %v1142_v14 = vpop.f32.mrf.mxu1 }
 0x728   : > { %v1174_v15 = vsel %vm1166_vm3, %v1158_v8, -inf  ;;  %v1161_v16 = vcombine.high %v1151_v10, %v1151_v10  ;;  %v1209_v17 = vsel %vm1166_vm3, %v1151_v10, -inf  ;;  %v1143_v18 = vadd.f32 %v1884_v62, %v1142_v14 }
 0x729   : > { %v1198_v19 = vrot.slane %v1197_v11, 2  ;;  %v1204_v20 = vmax.f32 %v1202_v7, %v1203_v12  ;;  %v1169_v21 = vmax.f32 %v1167_v9, %v1168_v13  ;;  %v1175_v22 = vrot.slane %v1174_v15, 4 }
 0x72a   : > { %v1210_v23 = vrot.slane %v1209_v17, 4  ;;  %v1216_v24 = vsel %vm1166_vm3, %v1161_v16, -inf  ;;  %v1159_v25 = vcombine.high %v1143_v18, %v1143_v18  ;;  %v1181_v26 = vsel %vm1166_vm3, %v1143_v18, -inf }
 0x72b   : > { %v1199_v27 = vmax.f32 %v1197_v11, %v1198_v19  ;;  %v1205_v28 = vrot.slane %v1204_v20, 2  ;;  %v1170_v29 = vrot.slane %v1169_v21, 2  ;;  %v1176_v30 = vmax.f32 %v1174_v15, %v1175_v22 }
 0x72c   : > { %v1211_v31 = vmax.f32 %v1209_v17, %v1210_v23  ;;  %v1217_v32 = vrot.slane %v1216_v24, 4  ;;  %v1182_v33 = vrot.slane %v1181_v26, 4  ;;  %v1188_v34 = vsel %vm1166_vm3, %v1159_v25, -inf }
 0x72d   : > { %v1206_v35 = vmax.f32 %v1204_v20, %v1205_v28  ;;  %v1171_v36 = vmax.f32 %v1169_v21, %v1170_v29  ;;  %v1177_v37 = vrot.slane %v1176_v30, 2  ;;  %v1189_v41 = vrot.slane %v1188_v34, 4 }
 0x72e   : > { %v1212_v38 = vrot.slane %v1211_v31, 2  ;;  %v1218_v39 = vmax.f32 %v1216_v24, %v1217_v32  ;;  %v1183_v40 = vmax.f32 %v1181_v26, %v1182_v33  ;;  %v1200_v42 = vrot.slane %v1199_v27, 1 }
 0x72f   : > { %v1207_v43 = vrot.slane %v1206_v35, 1  ;;  %v1172_v44 = vrot.slane %v1171_v36, 1  ;;  %v1178_v45 = vmax.f32 %v1176_v30, %v1177_v37  ;;  %v1190_v49 = vmax.f32 %v1188_v34, %v1189_v41 }
 0x730   : > { %v1213_v46 = vmax.f32 %v1211_v31, %v1212_v38  ;;  %v1219_v47 = vrot.slane %v1218_v39, 2  ;;  %v1184_v48 = vrot.slane %v1183_v40, 2  ;;  %v1201_v56 = vmax.f32 %v1199_v27, %v1200_v42 }
 0x731   : > { %v1173_v50 = vmax.f32 %v1171_v36, %v1172_v44  ;;  %v1179_v51 = vrot.slane %v1178_v45, 1  ;;  %v1191_v55 = vrot.slane %v1190_v49, 2  ;;  %v1208_v58 = vmax.f32 %v1206_v35, %v1207_v43 }
 0x732   : > { %v1214_v52 = vrot.slane %v1213_v46, 1  ;;  %v1220_v53 = vmax.f32 %v1218_v39, %v1219_v47  ;;  %v1185_v54 = vmax.f32 %v1183_v40, %v1184_v48  ;;  %v1234_v5 = vadd.f32 %v1893_v59, %v1201_v56 }
 0x733   : > { %v1180_v57 = vmax.f32 %v1178_v45, %v1179_v51  ;;  %v1192_v62 = vmax.f32 %v1190_v49, %v1191_v55  ;;  %v1230_v63 = vadd.f32 %v1893_v59, %v1173_v50  ;;  %v1235_v7 = vadd.f32 %v1893_v59, %v1208_v58 }
 0x734   : > { %v1221_v60 = vrot.slane %v1220_v53, 1  ;;  %v1186_v61 = vrot.slane %v1185_v54, 1  ;;  %v1215_v1 = vmax.f32 %v1213_v46, %v1214_v52  ;;  %v1242_v16 = vmax.f32 %v1234_v5, 0.0 }
 0x735   : > { %v1231_v0 = vadd.f32 %v1893_v59, %v1180_v57  ;;  %v1193_v3 = vrot.slane %v1192_v62, 1  ;;  %v1238_v10 = vmax.f32 %v1230_v63, 0.0  ;;  %v1243_v20 = vmax.f32 %v1235_v7, 0.0 }
 0x736   : > { %v1187_v2 = vmax.f32 %v1185_v54, %v1186_v61  ;;  %v1222_v4 = vmax.f32 %v1220_v53, %v1221_v60  ;;  %v1236_v12 = vadd.f32 %v1893_v59, %v1215_v1  ;;  %v1263_v25 = vrot.slane %v1242_v16, 4 }
 0x737   : > { %v1239_v6 = vmax.f32 %v1231_v0, 0.0  ;;  %v1194_v8 = vmax.f32 %v1192_v62, %v1193_v3  ;;  %v1266_v27 = vrot.slane %v1243_v20, 3 }
 0x738   : > { %v1232_v9 = vadd.f32 %v1893_v59, %v1187_v2  ;;  %v1237_v15 = vadd.f32 %v1893_v59, %v1222_v4  ;;  %v1244_v21 = vmax.f32 %v1236_v12, 0.0  ;;  %v2164_v12 = vld [vmem:[%s2897_s10 + $0x28] sm:$0xff]  }
 0x739   : > { %v1254_v11 = vrot.slane %v1239_v6, 7  ;;  %v1233_v13 = vadd.f32 %v1893_v59, %v1194_v8 }
 0x73a   : > { %v1240_v14 = vmax.f32 %v1232_v9, 0.0  ;;  %v1245_v22 = vmax.f32 %v1237_v15, 0.0  ;;  %v1269_v29 = vrot.slane %v1244_v21, 2  ;;  %v2162_v9 = vld [vmem:[%s2897_s10 + $0x38] sm:$0xff]   ;;  %v2167_v15 = vld [vmem:[%s2897_s10 + $0x10] sm:$0xff]  }
 0x73b   : > { %v1256_v17 = vsel %vm1255_vm4, %v1254_v11, %v1238_v10  ;;  %v1241_v18 = vmax.f32 %v1233_v13, 0.0  ;;  %v2163_v11 = vld [vmem:[%s2897_s10 + $0x30] sm:$0xff]   ;;  %v2165_v13 = vld [vmem:[%s2897_s10 + $0x20] sm:$0xff]  }
 0x73c   : > { %v1257_v19 = vrot.slane %v1240_v14, 6  ;;  %v1272_v31 = vrot.slane %v1245_v22, 1 }
 0x73d   : > { %v1260_v24 = vrot.slane %v1241_v18, 5 }
 0x73e   : > { %v1259_v23 = vsel %vm1258_vm5, %v1257_v19, %v1256_v17  ;;  %v2169_v17 = vld [vmem:[%s2897_s10] sm:$0xff]  }
 0x73f   : > { %v1262_v26 = vsel %vm1261_vm6, %v1260_v24, %v1259_v23 }
 0x740   : > { %v1265_v28 = vsel %vm1264_vm7, %v1263_v25, %v1262_v26 }
 0x741   : > { %v1268_v30 = vsel %vm1267_vm8, %v1266_v27, %v1265_v28 }
 0x742   : > { %v1271_v32 = vsel %vm1270_vm9, %v1269_v29, %v1268_v30 }
 0x743   : > { %v1274_v33 = vsel %vm1273_vm10, %v1272_v31, %v1271_v32 }
 0x744   : > { %1276 = vadd.xlane.f32.xlu0 %v1274_v33 }
 0x7cd   : > { %v1277_v34 = vpop.xlane.xlu0 %1276 }
 0x7ce   : > { %v1278_v35 = vmul.f32 0.0078125, %v1277_v34 }
 0x7d0   : > { %v1280_v36 = vrot.slane %v1278_v35, 1  ;;  %v1281_v37 = vrot.slane %v1278_v35, 2  ;;  %v1282_v38 = vrot.slane %v1278_v35, 3  ;;  %v1283_v39 = vrot.slane %v1278_v35, 4 }
 0x7d1   : > { %v1284_v40 = vrot.slane %v1278_v35, 5  ;;  %v1285_v41 = vrot.slane %v1278_v35, 6  ;;  %v1286_v42 = vrot.slane %v1278_v35, 7  ;;  %v2687_v43 = vsub.f32 %v1238_v10, %v1278_v35 }
 0x7d2   : > { %v2689_v44 = vsub.f32 %v1239_v6, %v1280_v36  ;;  %v2691_v45 = vsub.f32 %v1240_v14, %v1281_v37  ;;  %v2693_v46 = vsub.f32 %v1241_v18, %v1282_v38  ;;  %v2695_v47 = vsub.f32 %v1242_v16, %v1283_v39  ;;  %v2166_v14 = vld [vmem:[%s2897_s10 + $0x18] sm:$0xff]   ;;  %v2168_v16 = vld [vmem:[%s2897_s10 + $0x8] sm:$0xff]  }
 0x7d3   : > { %v2697_v48 = vsub.f32 %v1243_v20, %v1284_v40  ;;  %v2699_v49 = vsub.f32 %v1244_v21, %v1285_v41  ;;  %v2701_v50 = vsub.f32 %v1245_v22, %v1286_v42  ;;  %v1303_v55 = vmul.f32 %v2687_v43, %v2687_v43 }
 0x7d4   : > { %v1304_v51 = vmul.f32 %v2689_v44, %v2689_v44  ;;  %v1305_v52 = vmul.f32 %v2691_v45, %v2691_v45  ;;  %v1306_v53 = vmul.f32 %v2693_v46, %v2693_v46  ;;  %v1307_v54 = vmul.f32 %v2695_v47, %v2695_v47 }
 0x7d5   : > { %v1308_v56 = vmul.f32 %v2697_v48, %v2697_v48  ;;  %v1309_v59 = vmul.f32 %v2699_v49, %v2699_v49  ;;  %v1310_v60 = vmul.f32 %v2701_v50, %v2701_v50  ;;  %v2381_v10 = vmov 0.0  }
 0x7d6   : > { %v1319_v57 = vrot.slane %v1304_v51, 7  ;;  %v1321_v58 = vrot.slane %v1305_v52, 6  ;;  %v1323_v62 = vrot.slane %v1306_v53, 5  ;;  %v1325_v0 = vrot.slane %v1307_v54, 4  ;;  %2012 = vmatprep.subr.bf16.mxu0 %v2381_v10  ;;  %2028 = vmatprep.mubr.msk.bf16.mxu0 %vm2382_vm11, %v2381_v10 }
 0x7d7   : > { %v1327_v2 = vrot.slane %v1308_v56, 3  ;;  %v1329_v4 = vrot.slane %v1309_v59, 2  ;;  %v1331_v6 = vrot.slane %v1310_v60, 1  ;;  %2013 = vmatpush3.bf16.msra.mxu0 %v2162_v9  ;;  %2032 = vmatprep.subr.bf16.mxu1 %v2381_v10 }
 0x7d8   : > { %v1320_v61 = vsel %vm1255_vm4, %v1319_v57, %v1303_v55  ;;  %2014 = vmatprep.subr.bf16.mxu0 %v2381_v10  ;;  %2042 = vmatprep.mubr.msk.bf16.mxu1 %vm2382_vm11, %v2381_v10 }
 0x7d9   : > { %v1322_v63 = vsel %vm1258_vm5, %v1321_v58, %v1320_v61 }
 0x7da   : > { %v1324_v1 = vsel %vm1261_vm6, %v1323_v62, %v1322_v63 }
 0x7db   : > { %v1326_v3 = vsel %vm1264_vm7, %v1325_v0, %v1324_v1  ;;  %2015 = vmatpush3.bf16.msra.mxu0 %v2163_v11 }
 0x7dc   : > { %v1328_v5 = vsel %vm1267_vm8, %v1327_v2, %v1326_v3  ;;  %2016 = vmatprep.subr.bf16.mxu0 %v2381_v10 }
 0x7dd   : > { %v1330_v7 = vsel %vm1270_vm9, %v1329_v4, %v1328_v5  ;;  %v1894_v4 = vld [vmem:[%s2898_s11] ss:$0 sm:$0xff] }
 0x7de   : > { %v1332_v8 = vsel %vm1273_vm10, %v1331_v6, %v1330_v7 }
 0x7df   : > { %1334 = vadd.xlane.f32.xlu1 %v1332_v8  ;;  %2017 = vmatpush3.bf16.msra.mxu0 %v2164_v12 }
 0x7e0   : > { %2018 = vmatprep.subr.bf16.mxu0 %v2381_v10 }
 0x7e3   : > { %2019 = vmatpush3.bf16.msra.mxu0 %v2165_v13 }
 0x7e4   : > { %2020 = vmatprep.subr.bf16.mxu0 %v2381_v10 }
 0x7e7   : > { %2021 = vmatpush3.bf16.msra.mxu0 %v2166_v14 }
 0x7e8   : > { %2022 = vmatprep.subr.bf16.mxu0 %v2381_v10 }
 0x7eb   : > { %2023 = vmatpush3.bf16.msra.mxu0 %v2167_v15 }
 0x7ec   : > { %2024 = vmatprep.subr.bf16.mxu0 %v2381_v10 }
 0x7ef   : > { %2025 = vmatpush3.bf16.msra.mxu0 %v2168_v16 }
 0x7f0   : > { %2026 = vmatprep.subr.bf16.mxu0 %v2381_v10 }
 0x7f3   : > { %2027 = vmatpush3.bf16.msra.mxu0 %v2169_v17 }
 0x7f4   : > { %2046 = vmatprep.subr.bf16.mxu0 %v2381_v10 }
 0x868   : > { %v1335_v18 = vpop.xlane.xlu1 %1334 }
 0x869   : > { %v1336_v19 = vmul.f32 0.0078125, %v1335_v18  ;;  %v2170_v18 = vld [vmem:[%s2899_s12 + $0x20] sm:$0xff]  }
 0x86a   : > { %2033 = vmatpush3.bf16.msra.mxu1 %v2170_v18 }
 0x86b   : > { %v1337_v20 = vadd.f32 1e-05, %v1336_v19  ;;  %v2171_v19 = vld [vmem:[%s2899_s12 + $0x18] sm:$0xff]   ;;  %2034 = vmatprep.subr.bf16.mxu1 %v2381_v10 }
 0x86d   : > { %2204 = vrsqrt.f32 %v1337_v20  ;;  %v2172_v20 = vld [vmem:[%s2899_s12 + $0x10] sm:$0xff]  }
 0x86e   : > { %2035 = vmatpush3.bf16.msra.mxu1 %v2171_v19 }
 0x86f   : > { %2036 = vmatprep.subr.bf16.mxu1 %v2381_v10 }
 0x872   : > { %2037 = vmatpush3.bf16.msra.mxu1 %v2172_v20 }
 0x873   : > { %2038 = vmatprep.subr.bf16.mxu1 %v2381_v10 }
 0x87a   : > { %v2205_v21 = vpop.eup %2204 }
 0x87b   : > { %v1340_v22 = vrot.slane %v2205_v21, 1  ;;  %v1341_v23 = vrot.slane %v2205_v21, 2  ;;  %v1342_v24 = vrot.slane %v2205_v21, 3  ;;  %v1343_v25 = vrot.slane %v2205_v21, 4 }
 0x87c   : > { %v1344_v26 = vrot.slane %v2205_v21, 5  ;;  %v1345_v27 = vrot.slane %v2205_v21, 6  ;;  %v1346_v28 = vrot.slane %v2205_v21, 7  ;;  %v1355_v29 = vmul.f32 %v2205_v21, %v2687_v43  ;;  %v2173_v21 = vld [vmem:[%s2899_s12 + $0x8] sm:$0xff]  }
 0x87d   : > { %v1356_v30 = vmul.f32 %v1340_v22, %v2689_v44  ;;  %v1357_v31 = vmul.f32 %v1341_v23, %v2691_v45  ;;  %v1358_v32 = vmul.f32 %v1342_v24, %v2693_v46  ;;  %v1359_v33 = vmul.f32 %v1343_v25, %v2695_v47  ;;  %2039 = vmatpush3.bf16.msra.mxu1 %v2173_v21  ;;  %v2174_v22 = vld [vmem:[%s2899_s12] sm:$0xff]  }
 0x87e   : > { %v1360_v34 = vmul.f32 %v1344_v26, %v2697_v48  ;;  %v1361_v35 = vmul.f32 %v1345_v27, %v2699_v49  ;;  %v1362_v36 = vmul.f32 %v1346_v28, %v2701_v50  ;;  %v1363_v37 = vpack.c.bf16 %v1355_v29, %v1355_v29  ;;  %2040 = vmatprep.subr.bf16.mxu1 %v2381_v10  ;;  %v1903_v29 = vld [vmem:[%s2938_s20] ss:$0 sm:$0xff]  ;;  %s1728_s20 = scalar_lea.sflag [#allocation4], %s2591_s2 }
 0x87f   : > { %v1364_v38 = vpack.c.bf16 %v1356_v30, %v1356_v30  ;;  %v1365_v39 = vpack.c.bf16 %v1357_v31, %v1357_v31  ;;  %v1366_v40 = vpack.c.bf16 %v1358_v32, %v1358_v32  ;;  %v1367_v41 = vpack.c.bf16 %v1359_v33, %v1359_v33 }
 0x880   : > { %v1368_v42 = vpack.c.bf16 %v1360_v34, %v1360_v34  ;;  %v1369_v43 = vpack.c.bf16 %v1361_v35, %v1361_v35  ;;  %v1370_v44 = vpack.c.bf16 %v1362_v36, %v1362_v36  ;;  %v1402_v53 = vunpack.c.l.b16 %v1363_v37 }
 0x881   : > { %v1403_v51 = vunpack.c.l.b16 %v1364_v38  ;;  %v1404_v45 = vunpack.c.l.b16 %v1365_v39  ;;  %v1405_v52 = vunpack.c.l.b16 %v1366_v40  ;;  %v1406_v46 = vunpack.c.l.b16 %v1367_v41  ;;  %2041 = vmatpush3.bf16.msra.mxu1 %v2174_v22 }
 0x882   : > { %v1407_v47 = vunpack.c.l.b16 %v1368_v42  ;;  %v1408_v55 = vunpack.c.l.b16 %v1369_v43  ;;  %v1409_v49 = vunpack.c.l.b16 %v1370_v44  ;;  %v2175_v42 = vld [vmem:[%s2939_s27 + $0x20] sm:$0xff]   ;;  %v2176_v43 = vld [vmem:[%s2939_s27 + $0x18] sm:$0xff]   ;;  %v2177_v44 = vld [vmem:[%s2939_s27 + $0x10] sm:$0xff]  }
 0x883   : > { %v1410_v54 = vrot.slane %v1403_v51, 7  ;;  %v1412_v48 = vrot.slane %v1404_v45, 6  ;;  %v1414_v56 = vrot.slane %v1405_v52, 5  ;;  %v1416_v58 = vrot.slane %v1406_v46, 4  ;;  %v2178_v51 = vld [vmem:[%s2939_s27 + $0x8] sm:$0xff]   ;;  %v2179_v45 = vld [vmem:[%s2939_s27] sm:$0xff]  }
 0x884   : > { %v1418_v60 = vrot.slane %v1407_v47, 3  ;;  %v1420_v62 = vrot.slane %v1408_v55, 2  ;;  %v1422_v0 = vrot.slane %v1409_v49, 1  ;;  %v1910_v55 = vld [vmem:[%s2941_s16] ss:$0 sm:$0xff]  ;;  %s2296_s16 = scalar_lea.vmem %s2295_s30, 256 }
 0x885   : > { %v1411_v50 = vsel %vm1255_vm4, %v1410_v54, %v1402_v53  ;;  %p2298_p0 = scmp.lt.s32.totalorder %s2296_s16, %s2290_s15 }
 0x886   : > { %v1413_v57 = vsel %vm1258_vm5, %v1412_v48, %v1411_v50 }
 0x887   : > { %v1415_v59 = vsel %vm1261_vm6, %v1414_v56, %v1413_v57  ;;  %p2299_p5 = por %p2298_p0, %p2297_p13 }
 0x888   : > { %v1417_v61 = vsel %vm1264_vm7, %v1416_v58, %v1415_v59 }
 0x889   : > { %v1419_v63 = vsel %vm1267_vm8, %v1418_v60, %v1417_v61  ;;  %p2300_p10 = pnand %p2299_p5, %p2293_p2 }
 0x88a   : > { %v1421_v1 = vsel %vm1270_vm9, %v1420_v62, %v1419_v63 }
 0x88b   : > { %v1423_v2 = vsel %vm1273_vm10, %v1422_v0, %v1421_v1 }
 0x88c   : > { %v1424_v3 = vpack.c.b16 %v1423_v2, %v1423_v2 }
 0x88e   : > { %2029 = vmatmul.mubr.bf16.vlgmr.msra.gmra.mxu0 %v1424_v3 }
 0x88f   : > { %2056 = vmatprep.mubr.msk.bf16.mxu0 %vm2382_vm11, %v2381_v10  ;;  %2047 = vmatpush3.bf16.msra.mxu0 %v2175_v42 }
 0x890   : > { %2048 = vmatprep.subr.bf16.mxu0 %v2381_v10 }
 0x893   : > { %2049 = vmatpush3.bf16.msra.mxu0 %v2176_v43 }
 0x894   : > { %2050 = vmatprep.subr.bf16.mxu0 %v2381_v10 }
 0x897   : > { %2051 = vmatpush3.bf16.msra.mxu0 %v2177_v44 }
 0x898   : > { %2052 = vmatprep.subr.bf16.mxu0 %v2381_v10 }
 0x89b   : > { %2053 = vmatpush3.bf16.msra.mxu0 %v2178_v51 }
 0x89c   : > { %2054 = vmatprep.subr.bf16.mxu0 %v2381_v10 }
 0x89f   : > { %2055 = vmatpush3.bf16.msra.mxu0 %v2179_v45 }
 0x94e   : > { %v1508_v5 = vpop.f32.mrf.mxu0 }
 0x94f   : > { %v1509_v6 = vadd.f32 %v1894_v4, %v1508_v5 }
 0x950   : > { %v2030_v7 = vpop.f32.mrf.mxu0 }
 0x951   : > { %v1514_v8 = vmax.f32 %v1509_v6, 0.0 }
 0x952   : > { %v1511_v9 = vpop.f32.mrf.mxu0 }
 0x953   : > { %v1516_v11 = vsel %vm1515_vm12, %v1514_v8, 0.0 }
 0x954   : > { %1517 = vadd.xlane.f32.xlu0 %v1516_v11  ;;  %v2031_v12 = vpop.f32.mrf.mxu0 }
 0x9dd   : > { %v1518_v13 = vpop.xlane.xlu0 %1517 }
 0x9de   : > { %v1520_v14 = vmul.f32 0.0125, %v1518_v13 }
 0x9e0   : > { %v1521_v15 = vsub.f32 %v1514_v8, %v1520_v14 }
 0x9e2   : > { %v1522_v16 = vmul.f32 %v1521_v15, %v1521_v15 }
 0x9e4   : > { %v1523_v17 = vsel %vm1515_vm12, %v1522_v16, 0.0 }
 0x9e5   : > { %1524 = vadd.xlane.f32.xlu1 %v1523_v17 }
 0xa6e   : > { %v1525_v23 = vpop.xlane.xlu1 %1524 }
 0xa6f   : > { %v1526_v24 = vmul.f32 0.0125, %v1525_v23 }
 0xa71   : > { %v1527_v25 = vadd.f32 1e-05, %v1526_v24 }
 0xa73   : > { %2206 = vrsqrt.f32 %v1527_v25 }
 0xa80   : > { %v2207_v26 = vpop.eup %2206 }
 0xa81   : > { %v1529_v27 = vmul.f32 %v2207_v26, %v1521_v15 }
 0xa83   : > { %v1530_v28 = vpack.c.bf16 %v1529_v27, %v1529_v27 }
 0xa85   : > { %2043 = vmatmul.mubr.msk.bf16.vlgmr.msra.gmra.mxu1 %vm1515_vm12, %v1530_v28 }
 0xb45   : > { %v1615_v30 = vpop.f32.mrf.mxu1 }
 0xb46   : > { %v1616_v31 = vadd.f32 %v1903_v29, %v1615_v30 }
 0xb47   : > { %v2044_v32 = vpop.f32.mrf.mxu1 }
 0xb48   : > { %v1621_v33 = vmax.f32 %v1616_v31, 0.0 }
 0xb49   : > { %v1618_v34 = vpop.f32.mrf.mxu1 }
 0xb4a   : > { %v1622_v35 = vsel %vm1515_vm12, %v1621_v33, 0.0 }
 0xb4b   : > { %1623 = vadd.xlane.f32.xlu0 %v1622_v35  ;;  %v2045_v36 = vpop.f32.mrf.mxu1 }
 0xbd4   : > { %v1624_v37 = vpop.xlane.xlu0 %1623 }
 0xbd5   : > { %v1625_v38 = vmul.f32 0.0125, %v1624_v37 }
 0xbd7   : > { %v1626_v39 = vsub.f32 %v1621_v33, %v1625_v38 }
 0xbd9   : > { %v1627_v40 = vmul.f32 %v1626_v39, %v1626_v39 }
 0xbdb   : > { %v1628_v41 = vsel %vm1515_vm12, %v1627_v40, 0.0 }
 0xbdc   : > { %1629 = vadd.xlane.f32.xlu1 %v1628_v41 }
 0xc65   : > { %v1630_v52 = vpop.xlane.xlu1 %1629 }
 0xc66   : > { %v1631_v46 = vmul.f32 0.0125, %v1630_v52 }
 0xc68   : > { %v1632_v53 = vadd.f32 1e-05, %v1631_v46 }
 0xc6a   : > { %2208 = vrsqrt.f32 %v1632_v53 }
 0xc77   : > { %v2209_v47 = vpop.eup %2208 }
 0xc78   : > { %v1634_v54 = vmul.f32 %v2209_v47, %v1626_v39 }
 0xc7a   : > { %v1635_v48 = vpack.c.bf16 %v1634_v54, %v1634_v54 }
 0xc7c   : > { %2057 = vmatmul.mubr.msk.bf16.vlgmr.msra.gmra.mxu0 %vm1515_vm12, %v1635_v48 }
 0xd3c   : > { %v1720_v10 = vpop.f32.mrf.mxu0 }
 0xd3d   : > { %v1721_v49 = vadd.f32 %v1910_v55, %v1720_v10 }
 0xd3e   : > { %v2058_v50 = vpop.f32.mrf.mxu0 }
 0xd3f   : > { %1726 = vst [vmem:[%s602_s18] sm:$0xff] %v1721_v49 }
 0xd40   : > { %v1723_v56 = vpop.f32.mrf.mxu0 }
 0xd41   : > { %2303 = shalt.err (!%p2300_p10)
}
 0xd42   : > { %s2304_s6 = scalar_lea.hbm %s2839_s0, 128  ;;  %s2308_s13 = scalar_lea.hbm %s2943_s29, 256 }
 0xd43   : > { %p2305_p1 = scmp.ne.s32.totalorder %s2839_s0, %s2304_s6  ;;  %p2309_p12 = scmp.lt.s32.totalorder %s2839_s0, %s2943_s29 }
 0xd44   : > { %p2310_p3 = scmp.lt.s32.totalorder %s2308_s13, %s2304_s6 }
 0xd45   : > { %p2306_p4 = pnand %p2305_p1, %p2564_p7 }
 0xd46   : > { %p2311_p8 = por %p2310_p3, %p2309_p12 }
 0xd47   : > { %p2307_p6 = pneg %p2306_p4 }
 0xd49   : > { %p2312_p9 = pnand %p2311_p8, %p2307_p6 }
 0xd4b   : > { %2315 = shalt.err (!%p2312_p9)
}
 0xd4c   : > { %2070 = dma.vmem_to_hbm [thread:$0]  (%p2564_p7), %s2841_s14, 128, %s2839_s0, %s1728_s20   ;;  %v2059_v57 = vpop.f32.mrf.mxu0 }
 0xd4d PF: > { %s2944_s15 = sld [smem:[#allocation12_spill]]  ;;  %p2947_p2 = scmp.ge.s32.totalorder %s2374_s26, 2 }
 0xd4e   : > { %s2945_s24 = sld [smem:[#allocation13_spill]] }
 0xd53   : > { %s1754_s30 = sand.u32 1, %s2944_s15  }
 0xd54   : > { %p2946_p11 = scmp.ne.s32.totalorder %s2945_s24, 0  ;;  %s1755_s16 = scalar_lea.sflag [#allocation4], %s1754_s30 }
 0xd56   : > { %p2084_p13 = pnand %p2947_p2, %p2946_p11 }
 0xd58   : > { %p2085_p0 = pneg %p2084_p13 }
 0xd5a   : > { %2349 = dma.done.wait (%p2085_p0), %s1755_s16, 128  }
 0xd5b   : > { %2351 = vsyncadd (%p2085_p0), %s1755_s16, 4294967168  ;;  %s33_s26 = sadd.s32 1, %s2374_s26   ;;  %s2948_s19 = sld [smem:[#allocation14_spill]] }
 0xd5c   : > { %p30_p5 = scmp.ge.s32.totalorder %s33_s26, 4   ;;  %s2949_s21 = smov %s2358_s22 }
 0xd5d   : > { %s2950_s22 = smov %s2362_s23  ;;  %s2951_s23 = smov %s2573_s17 }
 0xd5e   : > { %s2952_s24 = smov %s2370_s25  ;;  %32 = sbr.rel (!%p30_p5) target bundleno = 15 (0xf), region = 140 }
 0xd61   : > { %s2953_s25 = smov %s2948_s19 }
 0xd63   :  { %1760 = vsyncpa [#allocation3], 1 }
 0xd64   :  { %1762 = vsyncpa [#allocation3 + $0x1], 1 }
 0xd65   :  { %1763 = vsyncpa [#allocation6], 1 }
 0xd66   :  { %1764 = vsyncpa [#allocation4], 1 }
 0xd67   :  { %1766 = vsyncpa [#allocation4 + $0x1], 1 }

</bundles_post_ra>
